<compile_context>
chip_gen: v6e
topology: v6e:2x2x1
jax: 0.10.0
libtpu: 0.0.40
codegen_flags: <defaults>
</compile_context>

<pallas_src>
import functools
from typing import Dict, Union

import jax
import jax.numpy as jnp
from jax.experimental import pallas as pl
from jax.experimental.pallas import tpu as pltpu


# Left/right zero pad (in lanes) of the flattened per-image activation inside
# the VMEM scratch.  Must be >= W + 1 (so every shifted 3x3 tap read stays in
# bounds and reads zeros for out-of-image rows) and a multiple of 128 so the
# scratch re-pad store is lane-aligned.
_PAD = 128


# ----------------------------------------------------------------------------
# Fused whole-network Pallas kernel (one grid step == one image)
# ----------------------------------------------------------------------------

def _xray_net_kernel(x_ref, w1_ref, b1_ref, w2_ref, b2_ref,
                     fw1_ref, fb1_ref, fw2_ref, fb2_ref,
                     *refs, H, W, capture):
    """Whole CNN forward for ONE image.

    x_ref : (Cin, H*W)      flattened NCHW image (row-major spatial)
    wN    : (9, Cout, Cin)  conv taps, tap index = kh*3 + kw
    bN    : (Cout, 1)
    fwN   : (out, in)       torch Linear weight, used as W @ column-vector
    fbN   : (out, 1)
    outputs (capture=True) : conv1, relu1, conv2, relu2  -> (Cout, H*W)
                             pool, fc1, relu3, fc2       -> (feat, 1)
    outputs (capture=False): relu3 only (the penultimate layer)
    scratch: two zero-padded (C, H*W + 2*_PAD) f32 buffers for shifted taps.
    """
    if capture:
        (c1_ref, r1_ref, c2_ref, r2_ref,
         pool_ref, fc1_ref, r3_ref, fc2_ref, s1_ref, s2_ref) = refs
    else:
        r3_ref, s1_ref, s2_ref = refs

    hw = H * W
    pad = (s1_ref.shape[1] - hw) // 2

    # Column-validity masks for horizontally shifted taps ("same" zero pad).
    col = jax.lax.broadcasted_iota(jnp.int32, (1, hw), 1) % W
    edge_ok = {-1: col >= 1, 0: None, 1: col <= W - 2}

    def conv3x3_bias(src_ref, w_ref, b_ref):
        # 3x3 "same" conv via 9 shifted reads of the zero-padded flat image,
        # accumulated in f32; the (Cout, H*W) result is lane-dense.
        cout = w_ref.shape[1]
        acc = jnp.zeros((cout, hw), jnp.float32)
        for kh in range(3):
            for kw in range(3):
                dh, dw = kh - 1, kw - 1
                start = pad + dh * W + dw
                tap = src_ref[:, start:start + hw]
                if edge_ok[dw] is not None:
                    tap = jnp.where(edge_ok[dw], tap, 0.0)
                acc = acc + jnp.dot(w_ref[kh * 3 + kw], tap,
                                    preferred_element_type=jnp.float32)
        return acc + b_ref[...]

    # ---- conv1 (+ fused bias & ReLU) --------------------------------------
    s1_ref[...] = jnp.zeros_like(s1_ref)
    s1_ref[:, pad:pad + hw] = x_ref[...]
    pre1 = conv3x3_bias(s1_ref, w1_ref, b1_ref)
    post1 = jnp.maximum(pre1, 0.0)

    # ---- conv2 (+ fused bias & ReLU); relu1 re-padded in VMEM scratch -----
    s2_ref[...] = jnp.zeros_like(s2_ref)
    s2_ref[:, pad:pad + hw] = post1
    pre2 = conv3x3_bias(s2_ref, w2_ref, b2_ref)
    post2 = jnp.maximum(pre2, 0.0)

    # ---- fused tail: GlobalAvgPool -> fc1 -> ReLU (-> fc2) ----------------
    pooled = jnp.sum(post2, axis=1, keepdims=True) * (1.0 / hw)      # (C2, 1)
    fc1 = jnp.dot(fw1_ref[...], pooled,
                  preferred_element_type=jnp.float32) + fb1_ref[...]
    relu3 = jnp.maximum(fc1, 0.0)

    if capture:
        c1_ref[...] = pre1
        r1_ref[...] = post1
        c2_ref[...] = pre2
        r2_ref[...] = post2
        pool_ref[...] = pooled
        fc1_ref[...] = fc1
        r3_ref[...] = relu3
        fc2_ref[...] = (jnp.dot(fw2_ref[...], relu3,
                                preferred_element_type=jnp.float32)
                        + fb2_ref[...])
    else:
        # penultimate-only: final Linear is skipped entirely.
        r3_ref[...] = relu3


def _xray_net_pallas(x_nchw, p, *, capture):
    N, Cin, H, W = x_nchw.shape
    HW = H * W
    C1 = p["conv1_w"].shape[1]
    C2 = p["conv2_w"].shape[1]
    F1 = p["fc1_w"].shape[0]
    F2 = p["fc2_w"].shape[0]

    x_flat = x_nchw.reshape(N, Cin, HW)        # free reshape, no transpose

    kernel = functools.partial(_xray_net_kernel, H=H, W=W, capture=capture)

    def per_image(c, last):
        return pl.BlockSpec((None, c, last), lambda n: (n, 0, 0))

    def whole(arr):
        return pl.BlockSpec(arr.shape, lambda n: (0,) * arr.ndim)

    if capture:
        out_shape = (
            jax.ShapeDtypeStruct((N, C1, HW), jnp.float32),   # conv1 pre
            jax.ShapeDtypeStruct((N, C1, HW), jnp.float32),   # relu1
            jax.ShapeDtypeStruct((N, C2, HW), jnp.float32),   # conv2 pre
            jax.ShapeDtypeStruct((N, C2, HW), jnp.float32),   # relu2
            jax.ShapeDtypeStruct((N, C2, 1), jnp.float32),    # pool
            jax.ShapeDtypeStruct((N, F1, 1), jnp.float32),    # fc1
            jax.ShapeDtypeStruct((N, F1, 1), jnp.float32),    # relu3
            jax.ShapeDtypeStruct((N, F2, 1), jnp.float32),    # fc2
        )
        out_specs = (
            per_image(C1, HW), per_image(C1, HW),
            per_image(C2, HW), per_image(C2, HW),
            per_image(C2, 1), per_image(F1, 1),
            per_image(F1, 1), per_image(F2, 1),
        )
    else:
        out_shape = jax.ShapeDtypeStruct((N, F1, 1), jnp.float32)
        out_specs = per_image(F1, 1)

    return pl.pallas_call(
        kernel,
        out_shape=out_shape,
        grid=(N,),
        in_specs=[
            per_image(Cin, HW),
            whole(p["conv1_w"]), whole(p["conv1_b"]),
            whole(p["conv2_w"]), whole(p["conv2_b"]),
            whole(p["fc1_w"]), whole(p["fc1_b"]),
            whole(p["fc2_w"]), whole(p["fc2_b"]),
        ],
        out_specs=out_specs,
        scratch_shapes=[
            pltpu.VMEM((Cin, HW + 2 * _PAD), jnp.float32),
            pltpu.VMEM((C1, HW + 2 * _PAD), jnp.float32),
        ],
        compiler_params=pltpu.CompilerParams(
            dimension_semantics=("parallel",)),   # images across TensorCores
    )(x_flat, p["conv1_w"], p["conv1_b"], p["conv2_w"], p["conv2_b"],
      p["fc1_w"], p["fc1_b"], p["fc2_w"], p["fc2_b"])


# ----------------------------------------------------------------------------
# jitted forward passes (feature capture vs. penultimate-only)
# ----------------------------------------------------------------------------

@jax.jit
def _forward_capture(x_nchw, params):
    (c1, r1, c2, r2, pool, fc1, r3, fc2) = _xray_net_pallas(
        x_nchw, params, capture=True)
    N, _, H, W = x_nchw.shape
    # Every captured feature is a free reshape of the kernel's lane-dense
    # outputs -- no NCHW transposes anywhere in the forward pass.
    return {
        "0-Conv2d-conv1": c1.reshape(N, -1, H, W),
        "1-ReLU-relu1": r1.reshape(N, -1, H, W),
        "2-Conv2d-conv2": c2.reshape(N, -1, H, W),
        "3-ReLU-relu2": r2.reshape(N, -1, H, W),
        "4-AdaptiveAvgPool2d-pool": pool.reshape(N, -1, 1, 1),
        "5-Flatten-flatten": pool.reshape(N, -1),
        "6-Linear-fc1": fc1.reshape(N, -1),
        "7-ReLU-relu3": r3.reshape(N, -1),
        "8-Linear-fc2": fc2.reshape(N, -1),
    }


@jax.jit
def _forward_penultimate(x_nchw, params):
    r3 = _xray_net_pallas(x_nchw, params, capture=False)
    return r3.reshape(x_nchw.shape[0], -1)


# ----------------------------------------------------------------------------
# FeatureExtractor equivalent
# ----------------------------------------------------------------------------

class FeatureExtractorPallas:
    """Mimics yupnets.xray.FeatureExtractor around a fixed small CNN.

    Returns a dict mapping "{idx}-{LayerKind}-{layer_id}" -> activation
    (NCHW for 4-D activations, matching torch), or only the penultimate
    layer's activation when penultimate_only=True.
    """
    # TODO(synk): torch-specific plumbing (register_forward_hook/hook.remove,
    # .cpu()/.cuda() device moves, torch.cuda.empty_cache, reset()) has no
    # Pallas equivalent; features are captured as extra kernel outputs.

    def __init__(self, penultimate_only: bool = False, seed: int = 42):
        self.penultimate_only = penultimate_only
        k = jax.random.split(jax.random.PRNGKey(seed), 8)
        f32 = jnp.float32
        self.raw_params = {
            # Conv2d(4, 8, 3, padding=1)
            "conv1_w": 0.1 * jax.random.normal(k[0], (8, 4, 3, 3), f32),
            "conv1_b": 0.01 * jax.random.normal(k[1], (8,), f32),
            # Conv2d(8, 16, 3, padding=1)
            "conv2_w": 0.1 * jax.random.normal(k[2], (16, 8, 3, 3), f32),
            "conv2_b": 0.01 * jax.random.normal(k[3], (16,), f32),
            # Linear(16, 32)
            "fc1_w": 0.1 * jax.random.normal(k[4], (32, 16), f32),
            "fc1_b": 0.01 * jax.random.normal(k[5], (32,), f32),
            # Linear(32, 10)
            "fc2_w": 0.1 * jax.random.normal(k[6], (10, 32), f32),
            "fc2_b": 0.01 * jax.random.normal(k[7], (10,), f32),
        }
        # Hoisted weight re-layouts (done once, not per call): conv kernels as
        # (kh*3+kw, Cout, Cin) taps, biases as column vectors, Linear weights
        # kept in their torch (out, in) layout (applied as W @ column-vector).
        r = self.raw_params
        self.params = {
            "conv1_w": jnp.transpose(r["conv1_w"], (2, 3, 0, 1)).reshape(9, 8, 4),
            "conv1_b": r["conv1_b"].reshape(8, 1),
            "conv2_w": jnp.transpose(r["conv2_w"], (2, 3, 0, 1)).reshape(9, 16, 8),
            "conv2_b": r["conv2_b"].reshape(16, 1),
            "fc1_w": r["fc1_w"],
            "fc1_b": r["fc1_b"].reshape(32, 1),
            "fc2_w": r["fc2_w"],
            "fc2_b": r["fc2_b"].reshape(10, 1),
        }

    def __call__(self, x_nchw) -> Union[Dict[str, jnp.ndarray], jnp.ndarray]:
        if self.penultimate_only:
            # penultimate feature == "7-ReLU-relu3" (second-to-last key);
            # capture (and the final Linear) are skipped entirely.
            return _forward_penultimate(x_nchw, self.params)
        return _forward_capture(x_nchw, self.params)


# ----------------------------------------------------------------------------
# Pure-JAX reference (torch layer semantics) for correctness checking
# ----------------------------------------------------------------------------

def _reference_forward(x, raw):
    hp = jax.lax.Precision.HIGHEST

    def conv(h, w, b):
        y = jax.lax.conv_general_dilated(
            h, w, window_strides=(1, 1), padding=((1, 1), (1, 1)),
            dimension_numbers=("NCHW", "OIHW", "NCHW"), precision=hp)
        return y + b[None, :, None, None]

    c1 = conv(x, raw["conv1_w"], raw["conv1_b"])
    r1 = jnp.maximum(c1, 0.0)
    c2 = conv(r1, raw["conv2_w"], raw["conv2_b"])
    r2 = jnp.maximum(c2, 0.0)
    pool = jnp.mean(r2, axis=(2, 3))
    fc1 = pool @ raw["fc1_w"].T + raw["fc1_b"]
    r3 = jnp.maximum(fc1, 0.0)
    fc2 = r3 @ raw["fc2_w"].T + raw["fc2_b"]
    return {"c1": c1, "r2": r2, "pool": pool, "r3": r3, "fc2": fc2}


# ----------------------------------------------------------------------------
if __name__ == "__main__":
    x = jax.random.normal(jax.random.PRNGKey(0), (2, 4, 16, 16), jnp.float32)

    extractor = FeatureExtractorPallas(penultimate_only=False)
    features = extractor(x)
    jax.block_until_ready(features)

    # shapes follow torch semantics
    assert features["0-Conv2d-conv1"].shape == (2, 8, 16, 16)
    assert features["3-ReLU-relu2"].shape == (2, 16, 16, 16)
    assert features["4-AdaptiveAvgPool2d-pool"].shape == (2, 16, 1, 1)
    assert features["8-Linear-fc2"].shape == (2, 10)

    # numerics vs. a pure-JAX reference of the same network
    ref = _reference_forward(x, extractor.raw_params)
    checks = [("0-Conv2d-conv1", ref["c1"]),
              ("3-ReLU-relu2", ref["r2"]),
              ("5-Flatten-flatten", ref["pool"]),
              ("7-ReLU-relu3", ref["r3"]),
              ("8-Linear-fc2", ref["fc2"])]
    for key, want in checks:
        err = float(jnp.max(jnp.abs(features[key] - want)))
        assert err < 1e-1, (key, err)

    # penultimate_only path (== second-to-last feature, "7-ReLU-relu3")
    penult = FeatureExtractorPallas(penultimate_only=True)(x)
    jax.block_until_ready(penult)
    assert penult.shape == (2, 32)
    assert float(jnp.max(jnp.abs(penult - ref["r3"]))) < 1e-1

    print("KERNEL_OK")
</pallas_src>

<mosaic_0001>
module attributes {stable_mosaic.version = 11 : i64} {
  func.func @_xray_net_kernel(%arg0: i32, %arg1: memref<1x4x256xf32, #tpu.memory_space<vmem>>, %arg2: memref<9x8x4xf32, #tpu.memory_space<vmem>>, %arg3: memref<8x1xf32, #tpu.memory_space<vmem>>, %arg4: memref<9x16x8xf32, #tpu.memory_space<vmem>>, %arg5: memref<16x1xf32, #tpu.memory_space<vmem>>, %arg6: memref<32x16xf32, #tpu.memory_space<vmem>>, %arg7: memref<32x1xf32, #tpu.memory_space<vmem>>, %arg8: memref<10x32xf32, #tpu.memory_space<vmem>>, %arg9: memref<10x1xf32, #tpu.memory_space<vmem>>, %arg10: memref<1x8x256xf32, #tpu.memory_space<vmem>>, %arg11: memref<1x8x256xf32, #tpu.memory_space<vmem>>, %arg12: memref<1x16x256xf32, #tpu.memory_space<vmem>>, %arg13: memref<1x16x256xf32, #tpu.memory_space<vmem>>, %arg14: memref<1x16x1xf32, #tpu.memory_space<vmem>>, %arg15: memref<1x32x1xf32, #tpu.memory_space<vmem>>, %arg16: memref<1x32x1xf32, #tpu.memory_space<vmem>>, %arg17: memref<1x10x1xf32, #tpu.memory_space<vmem>>, %arg18: memref<4x512xf32, #tpu.memory_space<vmem>>, %arg19: memref<8x512xf32, #tpu.memory_space<vmem>>) attributes {dimension_semantics = [#tpu.dimension_semantics<parallel>], iteration_bounds = array<i64: 2>, scalar_prefetch = 0 : i64, scratch_operands = 2 : i64, tpu.core_type = #tpu.core_type<tc>, window_params = [{transform_indices = @transform_0, window_bounds = array<i64: 1, 4, 256>}, {pipeline_mode = #tpu.pipeline_mode<synchronous>, transform_indices = @transform_1, window_bounds = array<i64: 9, 8, 4>}, {pipeline_mode = #tpu.pipeline_mode<synchronous>, transform_indices = @transform_2, window_bounds = array<i64: 8, 1>}, {pipeline_mode = #tpu.pipeline_mode<synchronous>, transform_indices = @transform_3, window_bounds = array<i64: 9, 16, 8>}, {pipeline_mode = #tpu.pipeline_mode<synchronous>, transform_indices = @transform_4, window_bounds = array<i64: 16, 1>}, {pipeline_mode = #tpu.pipeline_mode<synchronous>, transform_indices = @transform_5, window_bounds = array<i64: 32, 16>}, {pipeline_mode = #tpu.pipeline_mode<synchronous>, transform_indices = @transform_6, window_bounds = array<i64: 32, 1>}, {pipeline_mode = #tpu.pipeline_mode<synchronous>, transform_indices = @transform_7, window_bounds = array<i64: 10, 32>}, {pipeline_mode = #tpu.pipeline_mode<synchronous>, transform_indices = @transform_8, window_bounds = array<i64: 10, 1>}, {transform_indices = @transform_9, window_bounds = array<i64: 1, 8, 256>}, {transform_indices = @transform_10, window_bounds = array<i64: 1, 8, 256>}, {transform_indices = @transform_11, window_bounds = array<i64: 1, 16, 256>}, {transform_indices = @transform_12, window_bounds = array<i64: 1, 16, 256>}, {transform_indices = @transform_13, window_bounds = array<i64: 1, 16, 1>}, {transform_indices = @transform_14, window_bounds = array<i64: 1, 32, 1>}, {transform_indices = @transform_15, window_bounds = array<i64: 1, 32, 1>}, {transform_indices = @transform_16, window_bounds = array<i64: 1, 10, 1>}]} {
    %0 = tpu.iota {dimensions = array<i32: 1>} : vector<1x256xi32>
    %c16_i32 = arith.constant 16 : i32
    %c0_i32 = arith.constant 0 : i32
    %1 = arith.cmpi eq, %c16_i32, %c0_i32 : i32
    %c1_i32 = arith.constant 1 : i32
    %2 = arith.select %1, %c1_i32, %c16_i32 : i32
    %3 = vector.broadcast %2 : i32 to vector<1x256xi32>
    %4 = arith.remsi %0, %3 : vector<1x256xi32>
    %c0_i32_0 = arith.constant 0 : i32
    %5 = vector.broadcast %c0_i32_0 : i32 to vector<1x256xi32>
    %6 = arith.cmpi ne, %4, %5 : vector<1x256xi32>
    %c0_i32_1 = arith.constant 0 : i32
    %7 = vector.broadcast %c0_i32_1 : i32 to vector<1x256xi32>
    %8 = arith.cmpi slt, %4, %7 : vector<1x256xi32>
    %c0_i32_2 = arith.constant 0 : i32
    %9 = arith.cmpi slt, %2, %c0_i32_2 : i32
    %10 = vector.broadcast %9 : i1 to vector<1x256xi1>
    %11 = vector.broadcast %10 : vector<1x256xi1> to vector<1x256xi1>
    %12 = arith.xori %8, %11 : vector<1x256xi1>
    %13 = arith.andi %12, %6 : vector<1x256xi1>
    %14 = vector.broadcast %2 : i32 to vector<1x256xi32>
    %15 = arith.addi %4, %14 : vector<1x256xi32>
    %16 = arith.select %13, %15, %4 : vector<1x256xi1>, vector<1x256xi32>
    %c1_i32_3 = arith.constant 1 : i32
    %17 = vector.broadcast %c1_i32_3 : i32 to vector<1x256xi32>
    %18 = arith.cmpi sge, %16, %17 : vector<1x256xi32>
    %c14_i32 = arith.constant 14 : i32
    %19 = vector.broadcast %c14_i32 : i32 to vector<1x256xi32>
    %20 = arith.cmpi sle, %16, %19 : vector<1x256xi32>
    %cst = arith.constant 0.000000e+00 : f32
    %21 = vector.broadcast %cst : f32 to vector<4x512xf32>
    %c0 = arith.constant 0 : index
    %c0_4 = arith.constant 0 : index
    %22 = vector.load %arg18[%c0, %c0_4] : memref<4x512xf32, #tpu.memory_space<vmem>>, vector<4x512xf32>
    tpu.vector_store %arg18[%c0, %c0_4], %21 {strides = array<i32>} : memref<4x512xf32, #tpu.memory_space<vmem>>, vector<4x512xf32>,
    %c0_5 = arith.constant 0 : index
    %c0_6 = arith.constant 0 : index
    %c0_7 = arith.constant 0 : index
    %23 = vector.load %arg1[%c0_5, %c0_6, %c0_7] : memref<1x4x256xf32, #tpu.memory_space<vmem>>, vector<1x4x256xf32>
    %24 = vector.shape_cast %23 : vector<1x4x256xf32> to vector<4x256xf32>
    %c0_8 = arith.constant 0 : index
    %c128 = arith.constant 128 : index
    %25 = vector.load %arg18[%c0_8, %c128] : memref<4x512xf32, #tpu.memory_space<vmem>>, vector<4x256xf32>
    tpu.vector_store %arg18[%c0_8, %c128], %24 {strides = array<i32>} : memref<4x512xf32, #tpu.memory_space<vmem>>, vector<4x256xf32>,
    %cst_9 = arith.constant 0.000000e+00 : f32
    %26 = vector.broadcast %cst_9 : f32 to vector<8x256xf32>
    %c0_10 = arith.constant 0 : index
    %c111 = arith.constant 111 : index
    %27 = vector.load %arg18[%c0_10, %c111] : memref<4x512xf32, #tpu.memory_space<vmem>>, vector<4x256xf32>
    %cst_11 = arith.constant 0.000000e+00 : f32
    %28 = vector.shape_cast %18 : vector<1x256xi1> to vector<1x256xi1>
    %29 = vector.broadcast %28 : vector<1x256xi1> to vector<4x256xi1>
    %30 = vector.broadcast %cst_11 : f32 to vector<4x256xf32>
    %31 = arith.select %29, %27, %30 : vector<4x256xi1>, vector<4x256xf32>
    %c0_12 = arith.constant 0 : index
    %c0_13 = arith.constant 0 : index
    %c0_14 = arith.constant 0 : index
    %32 = vector.load %arg2[%c0_12, %c0_13, %c0_14] : memref<9x8x4xf32, #tpu.memory_space<vmem>>, vector<1x8x4xf32>
    %33 = vector.shape_cast %32 : vector<1x8x4xf32> to vector<8x4xf32>
    %cst_15 = arith.constant dense<0.000000e+00> : vector<8x256xf32>
    %34 = tpu.matmul %33, %31, %cst_15 {dimension_numbers = #tpu.dot_dimension_numbers<[1], [0], [0], [1], [0, 0, 1, 1], [], []>} : vector<8x4xf32>, vector<4x256xf32>, vector<8x256xf32> -> vector<8x256xf32>
    %35 = arith.addf %26, %34 : vector<8x256xf32>
    %c0_16 = arith.constant 0 : index
    %c112 = arith.constant 112 : index
    %36 = vector.load %arg18[%c0_16, %c112] : memref<4x512xf32, #tpu.memory_space<vmem>>, vector<4x256xf32>
    %c1 = arith.constant 1 : index
    %c0_17 = arith.constant 0 : index
    %c0_18 = arith.constant 0 : index
    %37 = vector.load %arg2[%c1, %c0_17, %c0_18] : memref<9x8x4xf32, #tpu.memory_space<vmem>>, vector<1x8x4xf32>
    %38 = vector.shape_cast %37 : vector<1x8x4xf32> to vector<8x4xf32>
    %cst_19 = arith.constant dense<0.000000e+00> : vector<8x256xf32>
    %39 = tpu.matmul %38, %36, %cst_19 {dimension_numbers = #tpu.dot_dimension_numbers<[1], [0], [0], [1], [0, 0, 1, 1], [], []>} : vector<8x4xf32>, vector<4x256xf32>, vector<8x256xf32> -> vector<8x256xf32>
    %40 = arith.addf %35, %39 : vector<8x256xf32>
    %c0_20 = arith.constant 0 : index
    %c113 = arith.constant 113 : index
    %41 = vector.load %arg18[%c0_20, %c113] : memref<4x512xf32, #tpu.memory_space<vmem>>, vector<4x256xf32>
    %cst_21 = arith.constant 0.000000e+00 : f32
    %42 = vector.shape_cast %20 : vector<1x256xi1> to vector<1x256xi1>
    %43 = vector.broadcast %42 : vector<1x256xi1> to vector<4x256xi1>
    %44 = vector.broadcast %cst_21 : f32 to vector<4x256xf32>
    %45 = arith.select %43, %41, %44 : vector<4x256xi1>, vector<4x256xf32>
    %c2 = arith.constant 2 : index
    %c0_22 = arith.constant 0 : index
    %c0_23 = arith.constant 0 : index
    %46 = vector.load %arg2[%c2, %c0_22, %c0_23] : memref<9x8x4xf32, #tpu.memory_space<vmem>>, vector<1x8x4xf32>
    %47 = vector.shape_cast %46 : vector<1x8x4xf32> to vector<8x4xf32>
    %cst_24 = arith.constant dense<0.000000e+00> : vector<8x256xf32>
    %48 = tpu.matmul %47, %45, %cst_24 {dimension_numbers = #tpu.dot_dimension_numbers<[1], [0], [0], [1], [0, 0, 1, 1], [], []>} : vector<8x4xf32>, vector<4x256xf32>, vector<8x256xf32> -> vector<8x256xf32>
    %49 = arith.addf %40, %48 : vector<8x256xf32>
    %c0_25 = arith.constant 0 : index
    %c127 = arith.constant 127 : index
    %50 = vector.load %arg18[%c0_25, %c127] : memref<4x512xf32, #tpu.memory_space<vmem>>, vector<4x256xf32>
    %cst_26 = arith.constant 0.000000e+00 : f32
    %51 = vector.shape_cast %18 : vector<1x256xi1> to vector<1x256xi1>
    %52 = vector.broadcast %51 : vector<1x256xi1> to vector<4x256xi1>
    %53 = vector.broadcast %cst_26 : f32 to vector<4x256xf32>
    %54 = arith.select %52, %50, %53 : vector<4x256xi1>, vector<4x256xf32>
    %c3 = arith.constant 3 : index
    %c0_27 = arith.constant 0 : index
    %c0_28 = arith.constant 0 : index
    %55 = vector.load %arg2[%c3, %c0_27, %c0_28] : memref<9x8x4xf32, #tpu.memory_space<vmem>>, vector<1x8x4xf32>
    %56 = vector.shape_cast %55 : vector<1x8x4xf32> to vector<8x4xf32>
    %cst_29 = arith.constant dense<0.000000e+00> : vector<8x256xf32>
    %57 = tpu.matmul %56, %54, %cst_29 {dimension_numbers = #tpu.dot_dimension_numbers<[1], [0], [0], [1], [0, 0, 1, 1], [], []>} : vector<8x4xf32>, vector<4x256xf32>, vector<8x256xf32> -> vector<8x256xf32>
    %58 = arith.addf %49, %57 : vector<8x256xf32>
    %c0_30 = arith.constant 0 : index
    %c128_31 = arith.constant 128 : index
    %59 = vector.load %arg18[%c0_30, %c128_31] : memref<4x512xf32, #tpu.memory_space<vmem>>, vector<4x256xf32>
    %c4 = arith.constant 4 : index
    %c0_32 = arith.constant 0 : index
    %c0_33 = arith.constant 0 : index
    %60 = vector.load %arg2[%c4, %c0_32, %c0_33] : memref<9x8x4xf32, #tpu.memory_space<vmem>>, vector<1x8x4xf32>
    %61 = vector.shape_cast %60 : vector<1x8x4xf32> to vector<8x4xf32>
    %cst_34 = arith.constant dense<0.000000e+00> : vector<8x256xf32>
    %62 = tpu.matmul %61, %59, %cst_34 {dimension_numbers = #tpu.dot_dimension_numbers<[1], [0], [0], [1], [0, 0, 1, 1], [], []>} : vector<8x4xf32>, vector<4x256xf32>, vector<8x256xf32> -> vector<8x256xf32>
    %63 = arith.addf %58, %62 : vector<8x256xf32>
    %c0_35 = arith.constant 0 : index
    %c129 = arith.constant 129 : index
    %64 = vector.load %arg18[%c0_35, %c129] : memref<4x512xf32, #tpu.memory_space<vmem>>, vector<4x256xf32>
    %cst_36 = arith.constant 0.000000e+00 : f32
    %65 = vector.shape_cast %20 : vector<1x256xi1> to vector<1x256xi1>
    %66 = vector.broadcast %65 : vector<1x256xi1> to vector<4x256xi1>
    %67 = vector.broadcast %cst_36 : f32 to vector<4x256xf32>
    %68 = arith.select %66, %64, %67 : vector<4x256xi1>, vector<4x256xf32>
    %c5 = arith.constant 5 : index
    %c0_37 = arith.constant 0 : index
    %c0_38 = arith.constant 0 : index
    %69 = vector.load %arg2[%c5, %c0_37, %c0_38] : memref<9x8x4xf32, #tpu.memory_space<vmem>>, vector<1x8x4xf32>
    %70 = vector.shape_cast %69 : vector<1x8x4xf32> to vector<8x4xf32>
    %cst_39 = arith.constant dense<0.000000e+00> : vector<8x256xf32>
    %71 = tpu.matmul %70, %68, %cst_39 {dimension_numbers = #tpu.dot_dimension_numbers<[1], [0], [0], [1], [0, 0, 1, 1], [], []>} : vector<8x4xf32>, vector<4x256xf32>, vector<8x256xf32> -> vector<8x256xf32>
    %72 = arith.addf %63, %71 : vector<8x256xf32>
    %c0_40 = arith.constant 0 : index
    %c143 = arith.constant 143 : index
    %73 = vector.load %arg18[%c0_40, %c143] : memref<4x512xf32, #tpu.memory_space<vmem>>, vector<4x256xf32>
    %cst_41 = arith.constant 0.000000e+00 : f32
    %74 = vector.shape_cast %18 : vector<1x256xi1> to vector<1x256xi1>
    %75 = vector.broadcast %74 : vector<1x256xi1> to vector<4x256xi1>
    %76 = vector.broadcast %cst_41 : f32 to vector<4x256xf32>
    %77 = arith.select %75, %73, %76 : vector<4x256xi1>, vector<4x256xf32>
    %c6 = arith.constant 6 : index
    %c0_42 = arith.constant 0 : index
    %c0_43 = arith.constant 0 : index
    %78 = vector.load %arg2[%c6, %c0_42, %c0_43] : memref<9x8x4xf32, #tpu.memory_space<vmem>>, vector<1x8x4xf32>
    %79 = vector.shape_cast %78 : vector<1x8x4xf32> to vector<8x4xf32>
    %cst_44 = arith.constant dense<0.000000e+00> : vector<8x256xf32>
    %80 = tpu.matmul %79, %77, %cst_44 {dimension_numbers = #tpu.dot_dimension_numbers<[1], [0], [0], [1], [0, 0, 1, 1], [], []>} : vector<8x4xf32>, vector<4x256xf32>, vector<8x256xf32> -> vector<8x256xf32>
    %81 = arith.addf %72, %80 : vector<8x256xf32>
    %c0_45 = arith.constant 0 : index
    %c144 = arith.constant 144 : index
    %82 = vector.load %arg18[%c0_45, %c144] : memref<4x512xf32, #tpu.memory_space<vmem>>, vector<4x256xf32>
    %c7 = arith.constant 7 : index
    %c0_46 = arith.constant 0 : index
    %c0_47 = arith.constant 0 : index
    %83 = vector.load %arg2[%c7, %c0_46, %c0_47] : memref<9x8x4xf32, #tpu.memory_space<vmem>>, vector<1x8x4xf32>
    %84 = vector.shape_cast %83 : vector<1x8x4xf32> to vector<8x4xf32>
    %cst_48 = arith.constant dense<0.000000e+00> : vector<8x256xf32>
    %85 = tpu.matmul %84, %82, %cst_48 {dimension_numbers = #tpu.dot_dimension_numbers<[1], [0], [0], [1], [0, 0, 1, 1], [], []>} : vector<8x4xf32>, vector<4x256xf32>, vector<8x256xf32> -> vector<8x256xf32>
    %86 = arith.addf %81, %85 : vector<8x256xf32>
    %c0_49 = arith.constant 0 : index
    %c145 = arith.constant 145 : index
    %87 = vector.load %arg18[%c0_49, %c145] : memref<4x512xf32, #tpu.memory_space<vmem>>, vector<4x256xf32>
    %cst_50 = arith.constant 0.000000e+00 : f32
    %88 = vector.shape_cast %20 : vector<1x256xi1> to vector<1x256xi1>
    %89 = vector.broadcast %88 : vector<1x256xi1> to vector<4x256xi1>
    %90 = vector.broadcast %cst_50 : f32 to vector<4x256xf32>
    %91 = arith.select %89, %87, %90 : vector<4x256xi1>, vector<4x256xf32>
    %c8 = arith.constant 8 : index
    %c0_51 = arith.constant 0 : index
    %c0_52 = arith.constant 0 : index
    %92 = vector.load %arg2[%c8, %c0_51, %c0_52] : memref<9x8x4xf32, #tpu.memory_space<vmem>>, vector<1x8x4xf32>
    %93 = vector.shape_cast %92 : vector<1x8x4xf32> to vector<8x4xf32>
    %cst_53 = arith.constant dense<0.000000e+00> : vector<8x256xf32>
    %94 = tpu.matmul %93, %91, %cst_53 {dimension_numbers = #tpu.dot_dimension_numbers<[1], [0], [0], [1], [0, 0, 1, 1], [], []>} : vector<8x4xf32>, vector<4x256xf32>, vector<8x256xf32> -> vector<8x256xf32>
    %95 = arith.addf %86, %94 : vector<8x256xf32>
    %c0_54 = arith.constant 0 : index
    %c0_55 = arith.constant 0 : index
    %96 = vector.load %arg3[%c0_54, %c0_55] : memref<8x1xf32, #tpu.memory_space<vmem>>, vector<8x1xf32>
    %97 = vector.broadcast %96 : vector<8x1xf32> to vector<8x256xf32>
    %98 = arith.addf %95, %97 : vector<8x256xf32>
    %cst_56 = arith.constant 0.000000e+00 : f32
    %99 = vector.broadcast %cst_56 : f32 to vector<8x256xf32>
    %100 = arith.maximumf %98, %99 : vector<8x256xf32>
    %cst_57 = arith.constant 0.000000e+00 : f32
    %101 = vector.broadcast %cst_57 : f32 to vector<8x512xf32>
    %c0_58 = arith.constant 0 : index
    %c0_59 = arith.constant 0 : index
    %102 = vector.load %arg19[%c0_58, %c0_59] : memref<8x512xf32, #tpu.memory_space<vmem>>, vector<8x512xf32>
    tpu.vector_store %arg19[%c0_58, %c0_59], %101 {strides = array<i32>} : memref<8x512xf32, #tpu.memory_space<vmem>>, vector<8x512xf32>,
    %c0_60 = arith.constant 0 : index
    %c128_61 = arith.constant 128 : index
    %103 = vector.load %arg19[%c0_60, %c128_61] : memref<8x512xf32, #tpu.memory_space<vmem>>, vector<8x256xf32>
    tpu.vector_store %arg19[%c0_60, %c128_61], %100 {strides = array<i32>} : memref<8x512xf32, #tpu.memory_space<vmem>>, vector<8x256xf32>,
    %cst_62 = arith.constant 0.000000e+00 : f32
    %104 = vector.broadcast %cst_62 : f32 to vector<16x256xf32>
    %c0_63 = arith.constant 0 : index
    %c111_64 = arith.constant 111 : index
    %105 = vector.load %arg19[%c0_63, %c111_64] : memref<8x512xf32, #tpu.memory_space<vmem>>, vector<8x256xf32>
    %cst_65 = arith.constant 0.000000e+00 : f32
    %106 = vector.shape_cast %18 : vector<1x256xi1> to vector<1x256xi1>
    %107 = vector.broadcast %106 : vector<1x256xi1> to vector<8x256xi1>
    %108 = vector.broadcast %cst_65 : f32 to vector<8x256xf32>
    %109 = arith.select %107, %105, %108 : vector<8x256xi1>, vector<8x256xf32>
    %c0_66 = arith.constant 0 : index
    %c0_67 = arith.constant 0 : index
    %c0_68 = arith.constant 0 : index
    %110 = vector.load %arg4[%c0_66, %c0_67, %c0_68] : memref<9x16x8xf32, #tpu.memory_space<vmem>>, vector<1x16x8xf32>
    %111 = vector.shape_cast %110 : vector<1x16x8xf32> to vector<16x8xf32>
    %cst_69 = arith.constant dense<0.000000e+00> : vector<16x256xf32>
    %112 = tpu.matmul %111, %109, %cst_69 {dimension_numbers = #tpu.dot_dimension_numbers<[1], [0], [0], [1], [0, 0, 1, 1], [], []>} : vector<16x8xf32>, vector<8x256xf32>, vector<16x256xf32> -> vector<16x256xf32>
    %113 = arith.addf %104, %112 : vector<16x256xf32>
    %c0_70 = arith.constant 0 : index
    %c112_71 = arith.constant 112 : index
    %114 = vector.load %arg19[%c0_70, %c112_71] : memref<8x512xf32, #tpu.memory_space<vmem>>, vector<8x256xf32>
    %c1_72 = arith.constant 1 : index
    %c0_73 = arith.constant 0 : index
    %c0_74 = arith.constant 0 : index
    %115 = vector.load %arg4[%c1_72, %c0_73, %c0_74] : memref<9x16x8xf32, #tpu.memory_space<vmem>>, vector<1x16x8xf32>
    %116 = vector.shape_cast %115 : vector<1x16x8xf32> to vector<16x8xf32>
    %cst_75 = arith.constant dense<0.000000e+00> : vector<16x256xf32>
    %117 = tpu.matmul %116, %114, %cst_75 {dimension_numbers = #tpu.dot_dimension_numbers<[1], [0], [0], [1], [0, 0, 1, 1], [], []>} : vector<16x8xf32>, vector<8x256xf32>, vector<16x256xf32> -> vector<16x256xf32>
    %118 = arith.addf %113, %117 : vector<16x256xf32>
    %c0_76 = arith.constant 0 : index
    %c113_77 = arith.constant 113 : index
    %119 = vector.load %arg19[%c0_76, %c113_77] : memref<8x512xf32, #tpu.memory_space<vmem>>, vector<8x256xf32>
    %cst_78 = arith.constant 0.000000e+00 : f32
    %120 = vector.shape_cast %20 : vector<1x256xi1> to vector<1x256xi1>
    %121 = vector.broadcast %120 : vector<1x256xi1> to vector<8x256xi1>
    %122 = vector.broadcast %cst_78 : f32 to vector<8x256xf32>
    %123 = arith.select %121, %119, %122 : vector<8x256xi1>, vector<8x256xf32>
    %c2_79 = arith.constant 2 : index
    %c0_80 = arith.constant 0 : index
    %c0_81 = arith.constant 0 : index
    %124 = vector.load %arg4[%c2_79, %c0_80, %c0_81] : memref<9x16x8xf32, #tpu.memory_space<vmem>>, vector<1x16x8xf32>
    %125 = vector.shape_cast %124 : vector<1x16x8xf32> to vector<16x8xf32>
    %cst_82 = arith.constant dense<0.000000e+00> : vector<16x256xf32>
    %126 = tpu.matmul %125, %123, %cst_82 {dimension_numbers = #tpu.dot_dimension_numbers<[1], [0], [0], [1], [0, 0, 1, 1], [], []>} : vector<16x8xf32>, vector<8x256xf32>, vector<16x256xf32> -> vector<16x256xf32>
    %127 = arith.addf %118, %126 : vector<16x256xf32>
    %c0_83 = arith.constant 0 : index
    %c127_84 = arith.constant 127 : index
    %128 = vector.load %arg19[%c0_83, %c127_84] : memref<8x512xf32, #tpu.memory_space<vmem>>, vector<8x256xf32>
    %cst_85 = arith.constant 0.000000e+00 : f32
    %129 = vector.shape_cast %18 : vector<1x256xi1> to vector<1x256xi1>
    %130 = vector.broadcast %129 : vector<1x256xi1> to vector<8x256xi1>
    %131 = vector.broadcast %cst_85 : f32 to vector<8x256xf32>
    %132 = arith.select %130, %128, %131 : vector<8x256xi1>, vector<8x256xf32>
    %c3_86 = arith.constant 3 : index
    %c0_87 = arith.constant 0 : index
    %c0_88 = arith.constant 0 : index
    %133 = vector.load %arg4[%c3_86, %c0_87, %c0_88] : memref<9x16x8xf32, #tpu.memory_space<vmem>>, vector<1x16x8xf32>
    %134 = vector.shape_cast %133 : vector<1x16x8xf32> to vector<16x8xf32>
    %cst_89 = arith.constant dense<0.000000e+00> : vector<16x256xf32>
    %135 = tpu.matmul %134, %132, %cst_89 {dimension_numbers = #tpu.dot_dimension_numbers<[1], [0], [0], [1], [0, 0, 1, 1], [], []>} : vector<16x8xf32>, vector<8x256xf32>, vector<16x256xf32> -> vector<16x256xf32>
    %136 = arith.addf %127, %135 : vector<16x256xf32>
    %c0_90 = arith.constant 0 : index
    %c128_91 = arith.constant 128 : index
    %137 = vector.load %arg19[%c0_90, %c128_91] : memref<8x512xf32, #tpu.memory_space<vmem>>, vector<8x256xf32>
    %c4_92 = arith.constant 4 : index
    %c0_93 = arith.constant 0 : index
    %c0_94 = arith.constant 0 : index
    %138 = vector.load %arg4[%c4_92, %c0_93, %c0_94] : memref<9x16x8xf32, #tpu.memory_space<vmem>>, vector<1x16x8xf32>
    %139 = vector.shape_cast %138 : vector<1x16x8xf32> to vector<16x8xf32>
    %cst_95 = arith.constant dense<0.000000e+00> : vector<16x256xf32>
    %140 = tpu.matmul %139, %137, %cst_95 {dimension_numbers = #tpu.dot_dimension_numbers<[1], [0], [0], [1], [0, 0, 1, 1], [], []>} : vector<16x8xf32>, vector<8x256xf32>, vector<16x256xf32> -> vector<16x256xf32>
    %141 = arith.addf %136, %140 : vector<16x256xf32>
    %c0_96 = arith.constant 0 : index
    %c129_97 = arith.constant 129 : index
    %142 = vector.load %arg19[%c0_96, %c129_97] : memref<8x512xf32, #tpu.memory_space<vmem>>, vector<8x256xf32>
    %cst_98 = arith.constant 0.000000e+00 : f32
    %143 = vector.shape_cast %20 : vector<1x256xi1> to vector<1x256xi1>
    %144 = vector.broadcast %143 : vector<1x256xi1> to vector<8x256xi1>
    %145 = vector.broadcast %cst_98 : f32 to vector<8x256xf32>
    %146 = arith.select %144, %142, %145 : vector<8x256xi1>, vector<8x256xf32>
    %c5_99 = arith.constant 5 : index
    %c0_100 = arith.constant 0 : index
    %c0_101 = arith.constant 0 : index
    %147 = vector.load %arg4[%c5_99, %c0_100, %c0_101] : memref<9x16x8xf32, #tpu.memory_space<vmem>>, vector<1x16x8xf32>
    %148 = vector.shape_cast %147 : vector<1x16x8xf32> to vector<16x8xf32>
    %cst_102 = arith.constant dense<0.000000e+00> : vector<16x256xf32>
    %149 = tpu.matmul %148, %146, %cst_102 {dimension_numbers = #tpu.dot_dimension_numbers<[1], [0], [0], [1], [0, 0, 1, 1], [], []>} : vector<16x8xf32>, vector<8x256xf32>, vector<16x256xf32> -> vector<16x256xf32>
    %150 = arith.addf %141, %149 : vector<16x256xf32>
    %c0_103 = arith.constant 0 : index
    %c143_104 = arith.constant 143 : index
    %151 = vector.load %arg19[%c0_103, %c143_104] : memref<8x512xf32, #tpu.memory_space<vmem>>, vector<8x256xf32>
    %cst_105 = arith.constant 0.000000e+00 : f32
    %152 = vector.shape_cast %18 : vector<1x256xi1> to vector<1x256xi1>
    %153 = vector.broadcast %152 : vector<1x256xi1> to vector<8x256xi1>
    %154 = vector.broadcast %cst_105 : f32 to vector<8x256xf32>
    %155 = arith.select %153, %151, %154 : vector<8x256xi1>, vector<8x256xf32>
    %c6_106 = arith.constant 6 : index
    %c0_107 = arith.constant 0 : index
    %c0_108 = arith.constant 0 : index
    %156 = vector.load %arg4[%c6_106, %c0_107, %c0_108] : memref<9x16x8xf32, #tpu.memory_space<vmem>>, vector<1x16x8xf32>
    %157 = vector.shape_cast %156 : vector<1x16x8xf32> to vector<16x8xf32>
    %cst_109 = arith.constant dense<0.000000e+00> : vector<16x256xf32>
    %158 = tpu.matmul %157, %155, %cst_109 {dimension_numbers = #tpu.dot_dimension_numbers<[1], [0], [0], [1], [0, 0, 1, 1], [], []>} : vector<16x8xf32>, vector<8x256xf32>, vector<16x256xf32> -> vector<16x256xf32>
    %159 = arith.addf %150, %158 : vector<16x256xf32>
    %c0_110 = arith.constant 0 : index
    %c144_111 = arith.constant 144 : index
    %160 = vector.load %arg19[%c0_110, %c144_111] : memref<8x512xf32, #tpu.memory_space<vmem>>, vector<8x256xf32>
    %c7_112 = arith.constant 7 : index
    %c0_113 = arith.constant 0 : index
    %c0_114 = arith.constant 0 : index
    %161 = vector.load %arg4[%c7_112, %c0_113, %c0_114] : memref<9x16x8xf32, #tpu.memory_space<vmem>>, vector<1x16x8xf32>
    %162 = vector.shape_cast %161 : vector<1x16x8xf32> to vector<16x8xf32>
    %cst_115 = arith.constant dense<0.000000e+00> : vector<16x256xf32>
    %163 = tpu.matmul %162, %160, %cst_115 {dimension_numbers = #tpu.dot_dimension_numbers<[1], [0], [0], [1], [0, 0, 1, 1], [], []>} : vector<16x8xf32>, vector<8x256xf32>, vector<16x256xf32> -> vector<16x256xf32>
    %164 = arith.addf %159, %163 : vector<16x256xf32>
    %c0_116 = arith.constant 0 : index
    %c145_117 = arith.constant 145 : index
    %165 = vector.load %arg19[%c0_116, %c145_117] : memref<8x512xf32, #tpu.memory_space<vmem>>, vector<8x256xf32>
    %cst_118 = arith.constant 0.000000e+00 : f32
    %166 = vector.shape_cast %20 : vector<1x256xi1> to vector<1x256xi1>
    %167 = vector.broadcast %166 : vector<1x256xi1> to vector<8x256xi1>
    %168 = vector.broadcast %cst_118 : f32 to vector<8x256xf32>
    %169 = arith.select %167, %165, %168 : vector<8x256xi1>, vector<8x256xf32>
    %c8_119 = arith.constant 8 : index
    %c0_120 = arith.constant 0 : index
    %c0_121 = arith.constant 0 : index
    %170 = vector.load %arg4[%c8_119, %c0_120, %c0_121] : memref<9x16x8xf32, #tpu.memory_space<vmem>>, vector<1x16x8xf32>
    %171 = vector.shape_cast %170 : vector<1x16x8xf32> to vector<16x8xf32>
    %cst_122 = arith.constant dense<0.000000e+00> : vector<16x256xf32>
    %172 = tpu.matmul %171, %169, %cst_122 {dimension_numbers = #tpu.dot_dimension_numbers<[1], [0], [0], [1], [0, 0, 1, 1], [], []>} : vector<16x8xf32>, vector<8x256xf32>, vector<16x256xf32> -> vector<16x256xf32>
    %173 = arith.addf %164, %172 : vector<16x256xf32>
    %c0_123 = arith.constant 0 : index
    %c0_124 = arith.constant 0 : index
    %174 = vector.load %arg5[%c0_123, %c0_124] : memref<16x1xf32, #tpu.memory_space<vmem>>, vector<16x1xf32>
    %175 = vector.broadcast %174 : vector<16x1xf32> to vector<16x256xf32>
    %176 = arith.addf %173, %175 : vector<16x256xf32>
    %cst_125 = arith.constant 0.000000e+00 : f32
    %177 = vector.broadcast %cst_125 : f32 to vector<16x256xf32>
    %178 = arith.maximumf %176, %177 : vector<16x256xf32>
    %cst_126 = arith.constant dense<0.000000e+00> : vector<16xf32>
    %179 = vector.multi_reduction <add>, %178, %cst_126 [1] : vector<16x256xf32> to vector<16xf32>
    %180 = vector.shape_cast %179 : vector<16xf32> to vector<16x1xf32>
    %cst_127 = arith.constant 3.906250e-03 : f32
    %181 = vector.broadcast %cst_127 : f32 to vector<16x1xf32>
    %182 = arith.mulf %180, %181 : vector<16x1xf32>
    %c0_128 = arith.constant 0 : index
    %c0_129 = arith.constant 0 : index
    %183 = vector.load %arg6[%c0_128, %c0_129] : memref<32x16xf32, #tpu.memory_space<vmem>>, vector<32x16xf32>
    %cst_130 = arith.constant dense<0.000000e+00> : vector<32x1xf32>
    %184 = tpu.matmul %183, %182, %cst_130 {dimension_numbers = #tpu.dot_dimension_numbers<[1], [0], [0], [1], [0, 0, 1, 1], [], []>} : vector<32x16xf32>, vector<16x1xf32>, vector<32x1xf32> -> vector<32x1xf32>
    %c0_131 = arith.constant 0 : index
    %c0_132 = arith.constant 0 : index
    %185 = vector.load %arg7[%c0_131, %c0_132] : memref<32x1xf32, #tpu.memory_space<vmem>>, vector<32x1xf32>
    %186 = arith.addf %184, %185 : vector<32x1xf32>
    %cst_133 = arith.constant 0.000000e+00 : f32
    %187 = vector.broadcast %cst_133 : f32 to vector<32x1xf32>
    %188 = arith.maximumf %186, %187 : vector<32x1xf32>
    %c0_134 = arith.constant 0 : index
    %c0_135 = arith.constant 0 : index
    %c0_136 = arith.constant 0 : index
    %189 = vector.load %arg10[%c0_134, %c0_135, %c0_136] : memref<1x8x256xf32, #tpu.memory_space<vmem>>, vector<1x8x256xf32>
    %190 = vector.shape_cast %189 : vector<1x8x256xf32> to vector<8x256xf32>
    %191 = vector.shape_cast %98 : vector<8x256xf32> to vector<1x8x256xf32>
    tpu.vector_store %arg10[%c0_134, %c0_135, %c0_136], %191 {strides = array<i32>} : memref<1x8x256xf32, #tpu.memory_space<vmem>>, vector<1x8x256xf32>,
    %c0_137 = arith.constant 0 : index
    %c0_138 = arith.constant 0 : index
    %c0_139 = arith.constant 0 : index
    %192 = vector.load %arg11[%c0_137, %c0_138, %c0_139] : memref<1x8x256xf32, #tpu.memory_space<vmem>>, vector<1x8x256xf32>
    %193 = vector.shape_cast %192 : vector<1x8x256xf32> to vector<8x256xf32>
    %194 = vector.shape_cast %100 : vector<8x256xf32> to vector<1x8x256xf32>
    tpu.vector_store %arg11[%c0_137, %c0_138, %c0_139], %194 {strides = array<i32>} : memref<1x8x256xf32, #tpu.memory_space<vmem>>, vector<1x8x256xf32>,
    %c0_140 = arith.constant 0 : index
    %c0_141 = arith.constant 0 : index
    %c0_142 = arith.constant 0 : index
    %195 = vector.load %arg12[%c0_140, %c0_141, %c0_142] : memref<1x16x256xf32, #tpu.memory_space<vmem>>, vector<1x16x256xf32>
    %196 = vector.shape_cast %195 : vector<1x16x256xf32> to vector<16x256xf32>
    %197 = vector.shape_cast %176 : vector<16x256xf32> to vector<1x16x256xf32>
    tpu.vector_store %arg12[%c0_140, %c0_141, %c0_142], %197 {strides = array<i32>} : memref<1x16x256xf32, #tpu.memory_space<vmem>>, vector<1x16x256xf32>,
    %c0_143 = arith.constant 0 : index
    %c0_144 = arith.constant 0 : index
    %c0_145 = arith.constant 0 : index
    %198 = vector.load %arg13[%c0_143, %c0_144, %c0_145] : memref<1x16x256xf32, #tpu.memory_space<vmem>>, vector<1x16x256xf32>
    %199 = vector.shape_cast %198 : vector<1x16x256xf32> to vector<16x256xf32>
    %200 = vector.shape_cast %178 : vector<16x256xf32> to vector<1x16x256xf32>
    tpu.vector_store %arg13[%c0_143, %c0_144, %c0_145], %200 {strides = array<i32>} : memref<1x16x256xf32, #tpu.memory_space<vmem>>, vector<1x16x256xf32>,
    %c0_146 = arith.constant 0 : index
    %c0_147 = arith.constant 0 : index
    %c0_148 = arith.constant 0 : index
    %201 = vector.load %arg14[%c0_146, %c0_147, %c0_148] : memref<1x16x1xf32, #tpu.memory_space<vmem>>, vector<1x16x1xf32>
    %202 = vector.shape_cast %201 : vector<1x16x1xf32> to vector<16x1xf32>
    %203 = vector.shape_cast %182 : vector<16x1xf32> to vector<1x16x1xf32>
    tpu.vector_store %arg14[%c0_146, %c0_147, %c0_148], %203 {strides = array<i32>} : memref<1x16x1xf32, #tpu.memory_space<vmem>>, vector<1x16x1xf32>,
    %c0_149 = arith.constant 0 : index
    %c0_150 = arith.constant 0 : index
    %c0_151 = arith.constant 0 : index
    %204 = vector.load %arg15[%c0_149, %c0_150, %c0_151] : memref<1x32x1xf32, #tpu.memory_space<vmem>>, vector<1x32x1xf32>
    %205 = vector.shape_cast %204 : vector<1x32x1xf32> to vector<32x1xf32>
    %206 = vector.shape_cast %186 : vector<32x1xf32> to vector<1x32x1xf32>
    tpu.vector_store %arg15[%c0_149, %c0_150, %c0_151], %206 {strides = array<i32>} : memref<1x32x1xf32, #tpu.memory_space<vmem>>, vector<1x32x1xf32>,
    %c0_152 = arith.constant 0 : index
    %c0_153 = arith.constant 0 : index
    %c0_154 = arith.constant 0 : index
    %207 = vector.load %arg16[%c0_152, %c0_153, %c0_154] : memref<1x32x1xf32, #tpu.memory_space<vmem>>, vector<1x32x1xf32>
    %208 = vector.shape_cast %207 : vector<1x32x1xf32> to vector<32x1xf32>
    %209 = vector.shape_cast %188 : vector<32x1xf32> to vector<1x32x1xf32>
    tpu.vector_store %arg16[%c0_152, %c0_153, %c0_154], %209 {strides = array<i32>} : memref<1x32x1xf32, #tpu.memory_space<vmem>>, vector<1x32x1xf32>,
    %c0_155 = arith.constant 0 : index
    %c0_156 = arith.constant 0 : index
    %210 = vector.load %arg8[%c0_155, %c0_156] : memref<10x32xf32, #tpu.memory_space<vmem>>, vector<10x32xf32>
    %cst_157 = arith.constant dense<0.000000e+00> : vector<10x1xf32>
    %211 = tpu.matmul %210, %188, %cst_157 {dimension_numbers = #tpu.dot_dimension_numbers<[1], [0], [0], [1], [0, 0, 1, 1], [], []>} : vector<10x32xf32>, vector<32x1xf32>, vector<10x1xf32> -> vector<10x1xf32>
    %c0_158 = arith.constant 0 : index
    %c0_159 = arith.constant 0 : index
    %212 = vector.load %arg9[%c0_158, %c0_159] : memref<10x1xf32, #tpu.memory_space<vmem>>, vector<10x1xf32>
    %213 = arith.addf %211, %212 : vector<10x1xf32>
    %c0_160 = arith.constant 0 : index
    %c0_161 = arith.constant 0 : index
    %c0_162 = arith.constant 0 : index
    %214 = vector.load %arg17[%c0_160, %c0_161, %c0_162] : memref<1x10x1xf32, #tpu.memory_space<vmem>>, vector<1x10x1xf32>
    %215 = vector.shape_cast %214 : vector<1x10x1xf32> to vector<10x1xf32>
    %216 = vector.shape_cast %213 : vector<10x1xf32> to vector<1x10x1xf32>
    tpu.vector_store %arg17[%c0_160, %c0_161, %c0_162], %216 {strides = array<i32>} : memref<1x10x1xf32, #tpu.memory_space<vmem>>, vector<1x10x1xf32>,
    return
  }
  func.func @transform_0(%arg0: i32) -> (i32, i32, i32) {
    %c0_i32 = arith.constant 0 : i32
    %c0_i32_0 = arith.constant 0 : i32
    %c0_i32_1 = arith.constant 0 : i32
    return %arg0, %c0_i32, %c0_i32_0 : i32, i32, i32
  }
  func.func @transform_1(%arg0: i32) -> (i32, i32, i32) {
    %c0_i32 = arith.constant 0 : i32
    %c0_i32_0 = arith.constant 0 : i32
    %c0_i32_1 = arith.constant 0 : i32
    %c0_i32_2 = arith.constant 0 : i32
    return %c0_i32, %c0_i32_0, %c0_i32_1 : i32, i32, i32
  }
  func.func @transform_2(%arg0: i32) -> (i32, i32) {
    %c0_i32 = arith.constant 0 : i32
    %c0_i32_0 = arith.constant 0 : i32
    %c0_i32_1 = arith.constant 0 : i32
    return %c0_i32, %c0_i32_0 : i32, i32
  }
  func.func @transform_3(%arg0: i32) -> (i32, i32, i32) {
    %c0_i32 = arith.constant 0 : i32
    %c0_i32_0 = arith.constant 0 : i32
    %c0_i32_1 = arith.constant 0 : i32
    %c0_i32_2 = arith.constant 0 : i32
    return %c0_i32, %c0_i32_0, %c0_i32_1 : i32, i32, i32
  }
  func.func @transform_4(%arg0: i32) -> (i32, i32) {
    %c0_i32 = arith.constant 0 : i32
    %c0_i32_0 = arith.constant 0 : i32
    %c0_i32_1 = arith.constant 0 : i32
    return %c0_i32, %c0_i32_0 : i32, i32
  }
  func.func @transform_5(%arg0: i32) -> (i32, i32) {
    %c0_i32 = arith.constant 0 : i32
    %c0_i32_0 = arith.constant 0 : i32
    %c0_i32_1 = arith.constant 0 : i32
    return %c0_i32, %c0_i32_0 : i32, i32
  }
  func.func @transform_6(%arg0: i32) -> (i32, i32) {
    %c0_i32 = arith.constant 0 : i32
    %c0_i32_0 = arith.constant 0 : i32
    %c0_i32_1 = arith.constant 0 : i32
    return %c0_i32, %c0_i32_0 : i32, i32
  }
  func.func @transform_7(%arg0: i32) -> (i32, i32) {
    %c0_i32 = arith.constant 0 : i32
    %c0_i32_0 = arith.constant 0 : i32
    %c0_i32_1 = arith.constant 0 : i32
    return %c0_i32, %c0_i32_0 : i32, i32
  }
  func.func @transform_8(%arg0: i32) -> (i32, i32) {
    %c0_i32 = arith.constant 0 : i32
    %c0_i32_0 = arith.constant 0 : i32
    %c0_i32_1 = arith.constant 0 : i32
    return %c0_i32, %c0_i32_0 : i32, i32
  }
  func.func @transform_9(%arg0: i32) -> (i32, i32, i32) {
    %c0_i32 = arith.constant 0 : i32
    %c0_i32_0 = arith.constant 0 : i32
    %c0_i32_1 = arith.constant 0 : i32
    return %arg0, %c0_i32, %c0_i32_0 : i32, i32, i32
  }
  func.func @transform_10(%arg0: i32) -> (i32, i32, i32) {
    %c0_i32 = arith.constant 0 : i32
    %c0_i32_0 = arith.constant 0 : i32
    %c0_i32_1 = arith.constant 0 : i32
    return %arg0, %c0_i32, %c0_i32_0 : i32, i32, i32
  }
  func.func @transform_11(%arg0: i32) -> (i32, i32, i32) {
    %c0_i32 = arith.constant 0 : i32
    %c0_i32_0 = arith.constant 0 : i32
    %c0_i32_1 = arith.constant 0 : i32
    return %arg0, %c0_i32, %c0_i32_0 : i32, i32, i32
  }
  func.func @transform_12(%arg0: i32) -> (i32, i32, i32) {
    %c0_i32 = arith.constant 0 : i32
    %c0_i32_0 = arith.constant 0 : i32
    %c0_i32_1 = arith.constant 0 : i32
    return %arg0, %c0_i32, %c0_i32_0 : i32, i32, i32
  }
  func.func @transform_13(%arg0: i32) -> (i32, i32, i32) {
    %c0_i32 = arith.constant 0 : i32
    %c0_i32_0 = arith.constant 0 : i32
    %c0_i32_1 = arith.constant 0 : i32
    return %arg0, %c0_i32, %c0_i32_0 : i32, i32, i32
  }
  func.func @transform_14(%arg0: i32) -> (i32, i32, i32) {
    %c0_i32 = arith.constant 0 : i32
    %c0_i32_0 = arith.constant 0 : i32
    %c0_i32_1 = arith.constant 0 : i32
    return %arg0, %c0_i32, %c0_i32_0 : i32, i32, i32
  }
  func.func @transform_15(%arg0: i32) -> (i32, i32, i32) {
    %c0_i32 = arith.constant 0 : i32
    %c0_i32_0 = arith.constant 0 : i32
    %c0_i32_1 = arith.constant 0 : i32
    return %arg0, %c0_i32, %c0_i32_0 : i32, i32, i32
  }
  func.func @transform_16(%arg0: i32) -> (i32, i32, i32) {
    %c0_i32 = arith.constant 0 : i32
    %c0_i32_0 = arith.constant 0 : i32
    %c0_i32_1 = arith.constant 0 : i32
    return %arg0, %c0_i32, %c0_i32_0 : i32, i32, i32
  }
}

</mosaic_0001>

<bundles_post_ra>
// kernel: _forward_capture.1
= control target key start
LH: loop header
LB: loop body
LE: loop exit
PB: predicated region body
PF: predicated region fallthrough
CT: control target
= control target key end

     0   :  { %s3266_s21 = smov 0   ;;  %s3731_s0 = inlined_call_operand.vmem [shape: f32[2,4,256], index: 0, kind: input, shape index: {}]   ;;  %s3732_s1 = inlined_call_operand.vmem [shape: f32[9,8,4], index: 1, kind: input, shape index: {}]   ;;  %s3733_s2 = inlined_call_operand.vmem [shape: f32[8,1], index: 2, kind: input, shape index: {}]   ;;  %s3734_s3 = inlined_call_operand.vmem [shape: f32[9,16,8], index: 3, kind: input, shape index: {}]   ;;  %s3735_s4 = inlined_call_operand.vmem [shape: f32[16,1], index: 4, kind: input, shape index: {}]   ;;  %s3736_s5 = inlined_call_operand.vmem [shape: f32[32,16], index: 5, kind: input, shape index: {}]   ;;  %s3737_s6 = inlined_call_operand.vmem [shape: f32[32,1], index: 6, kind: input, shape index: {}]   ;;  %s3738_s7 = inlined_call_operand.vmem [shape: f32[10,32], index: 7, kind: input, shape index: {}]   ;;  %s3739_s8 = inlined_call_operand.vmem [shape: f32[10,1], index: 8, kind: input, shape index: {}]   ;;  %s3740_s9 = inlined_call_operand.vmem [shape: f32[2,8,256], index: 9, kind: output, shape index: {0}]   ;;  %s3741_s10 = inlined_call_operand.vmem [shape: f32[2,8,256], index: 10, kind: output, shape index: {1}]   ;;  %s3742_s11 = inlined_call_operand.vmem [shape: f32[2,16,256], index: 11, kind: output, shape index: {2}]   ;;  %s3743_s12 = inlined_call_operand.vmem [shape: f32[2,16,256], index: 12, kind: output, shape index: {3}]   ;;  %s3744_s13 = inlined_call_operand.vmem [shape: f32[2,16,1], index: 13, kind: output, shape index: {4}]   ;;  %s3745_s14 = inlined_call_operand.vmem [shape: f32[2,32,1], index: 14, kind: output, shape index: {5}]   ;;  %s3746_s15 = inlined_call_operand.vmem [shape: f32[2,32,1], index: 15, kind: output, shape index: {6}]   ;;  %s3747_s16 = inlined_call_operand.vmem [shape: f32[2,10,1], index: 16, kind: output, shape index: {7}]  }
   0x1   :  { %3752 = sst [smem:[#allocation4_spill]] %s3731_s0 }
   0x2 LB: > { %s2987_s22 = sadd.s32 4294967295, %s3169_s21   ;;  %p2991_p0 = scmp.ge.s32.totalorder %s3169_s21, 1  ;;  %s3169_s21 = sphi %s3266_s21, %s27_s21  }
   0x3   : > { %p477_p1 = scmp.lt.s32.totalorder %s3169_s21, 3 }
   0x5   : > { %p478_p2 = pnand %p2991_p0, %p477_p1 }
   0x6   : > { %p562_p3 = scmp.lt.s32.totalorder (!%p478_p2), %s2987_s22, 1  ;;  %s3753_s26 = sld [smem:[#allocation4_spill]] (!%p478_p2) }
   0x7   : > { %481 = sbr.rel (%p478_p2) target bundleno = 1305 (0x519), region = 56  ;;  %s3172_s28 = smov (!%p478_p2), 17  }
   0x8   : > { %s3173_s29 = smov (!%p478_p2), 16   ;;  %s3174_s30 = smov (!%p478_p2), 15  }
   0x9   : > { %s3175_s0 = smov (!%p478_p2), 1   ;;  %s3176_s17 = smov (!%p478_p2), 127  }
   0xa   : > { %s3177_s18 = smov (!%p478_p2), 113   ;;  %s3750_s19 = smov (!%p478_p2), 112  }
   0xb   : > { %s3748_s20 = smov (!%p478_p2), 111  }
   0xc   : > { %v3171_v0 = vmov 0.0   ;;  %s3765_s22 = smov (!%p562_p3, %s2987_s22), 1  ;;  %v3179_v11 = vmov 0   ;;  %v1531_v13 = vld [vmem:[%s3733_s2] sm:$0xff]  ;;  %v607_v14 = vlaneseq  ;;  %vm657_vm0 = vcmask 138240   ;;  %v3010_v33 = vld [vmem:[%s3732_s1 + $0x8] sm:$0xff] }
   0xd   : > { %638 = vst [vmem:[#allocation2] sm:$0xff] %v3171_v0  ;;  %639 = vst [vmem:[#allocation2 + $0x8] sm:$0xff] %v3171_v0  ;;  %749 = vmatprep.mubr.f32.mxu0 %v3171_v0  ;;  %829 = vmatprep.mubr.f32.mxu1 %v3171_v0  ;;  %s3099_s23 = sshll.u32 %s3765_s22, 3  ;;  %vm673_vm1 = vcmask 130048   ;;  %vm680_vm2 = vcmask 1043456   ;;  %vm676_vm5 = vcmask 31744  }
   0xe   : > { %s566_s27 = scalar_lea.vmem %s3753_s26, %s3099_s23  ;;  %3159 = vset.pattern.permute.xlu0 %v3179_v11  ;;  %3160 = vset.pattern.permute.xlu1 %v3179_v11  ;;  %v608_v15 = vand.u32 127, %v607_v14  ;;  %vm851_vm6 = vcmask 121856   ;;  %v664_v36 = vld [vmem:[%s3732_s1] sm:$0xff]  ;;  %vm953_vm9 = vcmask 7168   ;;  %v3017_v45 = vld [vmem:[%s3732_s1 + $0x10] sm:$0xff]  ;;  %vm1140_vm10 = vcmask 1039360  }
   0xf   : > { %v3284_v1 = vld [vmem:[%s566_s27] sm:$0xff]  ;;  %v3021_v52 = vld [vmem:[%s3732_s1 + $0x18] sm:$0xff]  ;;  %v3029_v61 = vld [vmem:[%s3732_s1 + $0x28] sm:$0xff]  ;;  %vm1242_vm11 = vcmask 924672   ;;  %vm1346_vm12 = vcmask 916480   ;;  %vm1440_vm13 = vcmask 908288  }
  0x10   : > { %641 = vst [vmem:[#allocation2 + $0x4] sm:$0xff] %v3284_v1  ;;  %v3301_v7 = vcombine.high %v3284_v1, %v3284_v1  ;;  %v609_v18 = vadd.s32 128, %v608_v15  ;;  %v614_v22 = vand.u32 15, %v608_v15  ;;  %v3025_v53 = vld [vmem:[%s3732_s1 + $0x20] sm:$0xff]  ;;  %s3454_s23 = sshll.u32 %s3765_s22, 4  ;;  %vm1580_vm14 = vcmask 64512  }
  0x11   : > { %s571_s26 = scalar_lea.vmem %s3740_s9, %s3454_s23  ;;  %v3081_v25 = vld [vmem:[%s3734_s3 + $0x70] sm:$0xff]  ;;  %v3086_v38 = vld [vmem:[%s3734_s3 + $0x88] sm:$0xff]  ;;  %vm2616_vm15 = vcmask 261120  }
  0x12   : > { %v621_v21 = vand.u32 15, %v609_v18  ;;  %vm3336_vm4 = vcmp.ge.s32.totalorder %v614_v22, 1  ;;  %vm3357_vm7 = vcmp.le.s32.totalorder %v614_v22, 14 }
  0x14   : > { %v1130_v8 = vld [vmem:[#allocation2 + $0xc] sm:$0xf]  ;;  %vm3332_vm3 = vcmp.ge.s32.totalorder %v621_v21, 1  ;;  %vm3361_vm8 = vcmp.le.s32.totalorder %v621_v21, 14 }
  0x15   : > { %v1232_v9 = vld [vmem:[#allocation2 + $0xc] sm:$0xf] }
  0x16   : > { %v1334_v10 = vld [vmem:[#allocation2 + $0xc] sm:$0xf] }
  0x17   : > { %v643_v2 = vld [vmem:[#allocation2 + $0x8] sm:$0xf]  ;;  %v642_v3 = vld [vmem:[#allocation2] sm:$0xff]  ;;  %v1430_v12 = vld [vmem:[#allocation2 + $0xc] sm:$0xf] }
  0x18   : > { %655 = vrot.lane.b32.xlu1 %v643_v2, %s3172_s28  ;;  %671 = vrot.lane.b32.xlu0 %v643_v2, %s3173_s29  ;;  %v837_v4 = vld [vmem:[#allocation2 + $0x8] sm:$0xf]  ;;  %v844_v5 = vcombine.high %v642_v3, %v642_v3 }
  0x19   : > { %v943_v6 = vld [vmem:[#allocation2 + $0x8] sm:$0xf] }
  0x1c   : > { %651 = vrot.lane.b32.xlu1 %v642_v3, %s3172_s28  ;;  %667 = vrot.lane.b32.xlu0 %v642_v3, %s3173_s29 }
  0x20   : > { %849 = vrot.lane.b32.xlu1 %v837_v4, %s3174_s30  ;;  %845 = vrot.lane.b32.xlu0 %v642_v3, %s3174_s30 }
  0x24   : > { %653 = vrot.lane.b32.xlu1 %v844_v5, %s3172_s28  ;;  %669 = vrot.lane.b32.xlu0 %v844_v5, %s3173_s29 }
  0x28   : > { %949 = vrot.lane.b32.xlu1 %v844_v5, %s3175_s0  ;;  %847 = vrot.lane.b32.xlu0 %v844_v5, %s3174_s30 }
  0x2c   : > { %947 = vrot.lane.b32.xlu1 %v642_v3, %s3175_s0  ;;  %951 = vrot.lane.b32.xlu0 %v943_v6, %s3175_s0  ;;  %v3033_v6 = vld [vmem:[%s3732_s1 + $0x30] sm:$0xff] }
  0x30   : > { %1138 = vrot.lane.b32.xlu1 %v1130_v8, %s3176_s17  ;;  %1136 = vrot.lane.b32.xlu0 %v3301_v7, %s3176_s17 }
  0x34   : > { %1238 = vrot.lane.b32.xlu1 %v3301_v7, %s3177_s18  ;;  %1134 = vrot.lane.b32.xlu0 %v3284_v1, %s3176_s17 }
  0x38   : > { %1236 = vrot.lane.b32.xlu1 %v3284_v1, %s3177_s18  ;;  %1240 = vrot.lane.b32.xlu0 %v1232_v9, %s3177_s18 }
  0x3c   : > { %1344 = vrot.lane.b32.xlu1 %v1334_v10, %s3750_s19  ;;  %1342 = vrot.lane.b32.xlu0 %v3301_v7, %s3750_s19 }
  0x40   : > { %1436 = vrot.lane.b32.xlu1 %v3301_v7, %s3748_s20  ;;  %1340 = vrot.lane.b32.xlu0 %v3284_v1, %s3750_s19  ;;  %s576_s19 = scalar_lea.vmem %s3741_s10, %s3454_s23 }
  0x44   : > { %1434 = vrot.lane.b32.xlu1 %v3284_v1, %s3748_s20  ;;  %1438 = vrot.lane.b32.xlu0 %v1430_v12, %s3748_s20  ;;  %v3037_v12 = vld [vmem:[%s3732_s1 + $0x38] sm:$0xff] }
  0x48   : > { %1534 = vperm.xlu0 %3159, %v1531_v13   ;;  %1553 = vrot.lane.b32.xlu1 %v3171_v0, %s3172_s28 }
  0x4c   : > { %1570 = vrot.lane.b32.xlu0 %v3171_v0, %s3173_s29 }
  0x50   : > { %1747 = vrot.lane.b32.xlu0 %v3171_v0, %s3174_s30 }
  0x8a   : > { %v656_v16 = vpop.permute.xlu1 %655  ;;  %v672_v17 = vpop.permute.xlu0 %671 }
  0x8e   : > { %v652_v19 = vpop.permute.xlu1 %651  ;;  %v668_v20 = vpop.permute.xlu0 %667 }
  0x92   : > { %v850_v23 = vpop.permute.xlu1 %849  ;;  %v846_v24 = vpop.permute.xlu0 %845 }
  0x96   : > { %v654_v27 = vpop.permute.xlu1 %653  ;;  %v670_v28 = vpop.permute.xlu0 %669 }
  0x97   : > { %v658_v29 = vsel %vm657_vm0, %v652_v19, %v654_v27  ;;  %v675_v30 = vsel %vm673_vm1, %v670_v28, %v672_v17  ;;  %v674_v31 = vsel %vm673_vm1, %v668_v20, %v670_v28  ;;  %v659_v32 = vsel %vm657_vm0, %v654_v27, %v656_v16  ;;  %v3041_v20 = vld [vmem:[%s3732_s1 + $0x40] sm:$0xff] }
  0x98   : > { %3011 = vmatprep.subr.msk.mxu0 %vm680_vm2, %v675_v30  ;;  %v663_v34 = vsel %vm3332_vm3, %v659_v32, 0.0  ;;  %v662_v35 = vsel %vm3336_vm4, %v658_v29, 0.0 }
  0x99   : > { %3012 = vmatpush1.msk.msra.mxu0 %vm680_vm2, %v674_v31  ;;  %3014 = vmatprep.subr.msk.mxu1 %vm680_vm2, %v663_v34 }
  0x9a   : > { %3015 = vmatpush1.msk.msra.mxu1 %vm680_vm2, %v662_v35  ;;  %v950_v39 = vpop.permute.xlu1 %949  ;;  %v848_v40 = vpop.permute.xlu0 %847  ;;  %3013 = vmatmul.mubr.msk.f32.vlgmr.msra.gmra.mxu0 %vm676_vm5, %v3010_v33 }
  0x9b   : > { %v852_v41 = vsel %vm851_vm6, %v846_v24, %v848_v40  ;;  %v853_v42 = vsel %vm851_vm6, %v848_v40, %v850_v23  ;;  %3016 = vmatmul.mubr.msk.f32.vlgmr.msra.gmra.mxu1 %vm676_vm5, %v664_v36  ;;  %933 = vmatprep.mubr.f32.mxu0 %v3171_v0 }
  0x9c   : > { %v856_v43 = vsel %vm3357_vm7, %v852_v41, 0.0  ;;  %v857_v44 = vsel %vm3361_vm8, %v853_v42, 0.0  ;;  %1035 = vmatprep.mubr.f32.mxu1 %v3171_v0 }
  0x9d   : > { %3018 = vmatprep.subr.msk.mxu0 %vm680_vm2, %v857_v44 }
  0x9e   : > { %v948_v46 = vpop.permute.xlu1 %947  ;;  %3019 = vmatpush1.msk.msra.mxu0 %vm680_vm2, %v856_v43  ;;  %v952_v47 = vpop.permute.xlu0 %951 }
  0x9f   : > { %v954_v48 = vsel %vm953_vm9, %v948_v46, %v950_v39  ;;  %v955_v49 = vsel %vm953_vm9, %v950_v39, %v952_v47  ;;  %3020 = vmatmul.mubr.msk.f32.vlgmr.msra.gmra.mxu0 %vm676_vm5, %v3017_v45  ;;  %3026 = vmatprep.subr.msk.mxu0 %vm680_vm2, %v3301_v7 }
  0xa0   : > { %v958_v50 = vsel %vm3336_vm4, %v954_v48, 0.0  ;;  %v959_v51 = vsel %vm3332_vm3, %v955_v49, 0.0  ;;  %3027 = vmatpush1.msk.msra.mxu0 %vm680_vm2, %v3284_v1  ;;  %1120 = vmatprep.mubr.f32.mxu0 %v3171_v0 }
  0xa1   : > { %3022 = vmatprep.subr.msk.mxu1 %vm680_vm2, %v959_v51 }
  0xa2   : > { %v1139_v54 = vpop.permute.xlu1 %1138  ;;  %3023 = vmatpush1.msk.msra.mxu1 %vm680_vm2, %v958_v50  ;;  %v1137_v55 = vpop.permute.xlu0 %1136 }
  0xa3   : > { %v1142_v56 = vsel %vm1140_vm10, %v1137_v55, %v1139_v54  ;;  %3024 = vmatmul.mubr.msk.f32.vlgmr.msra.gmra.mxu1 %vm676_vm5, %v3021_v52  ;;  %3028 = vmatmul.mubr.msk.f32.vlgmr.msra.gmra.mxu0 %vm676_vm5, %v3025_v53 }
  0xa4   : > { %v1146_v57 = vsel %vm3361_vm8, %v1142_v56, 0.0  ;;  %1222 = vmatprep.mubr.f32.mxu1 %v3171_v0  ;;  %1324 = vmatprep.mubr.f32.mxu0 %v3171_v0 }
  0xa5   : > { %3030 = vmatprep.subr.msk.mxu1 %vm680_vm2, %v1146_v57 }
  0xa6   : > { %v1239_v58 = vpop.permute.xlu1 %1238  ;;  %v1135_v59 = vpop.permute.xlu0 %1134 }
  0xa7   : > { %v1141_v60 = vsel %vm1140_vm10, %v1135_v59, %v1137_v55 }
  0xa8   : > { %v1145_v62 = vsel %vm3357_vm7, %v1141_v60, 0.0 }
  0xa9   : > { %3031 = vmatpush1.msk.msra.mxu1 %vm680_vm2, %v1145_v62 }
  0xaa   : > { %v1237_v63 = vpop.permute.xlu1 %1236  ;;  %v1241_v1 = vpop.permute.xlu0 %1240  ;;  %3032 = vmatmul.mubr.msk.f32.vlgmr.msra.gmra.mxu1 %vm676_vm5, %v3029_v61 }
  0xab   : > { %v1243_v2 = vsel %vm1242_vm11, %v1237_v63, %v1239_v58  ;;  %v1244_v3 = vsel %vm1242_vm11, %v1239_v58, %v1241_v1  ;;  %1420 = vmatprep.mubr.f32.mxu1 %v3171_v0  ;;  %v2454_v1 = vld [vmem:[%s3735_s4 + $0x8] sm:$0xff] }
  0xac   : > { %v1247_v4 = vsel %vm3336_vm4, %v1243_v2, 0.0  ;;  %v1248_v5 = vsel %vm3332_vm3, %v1244_v3, 0.0  ;;  %v2453_v2 = vld [vmem:[%s3735_s4] sm:$0xff] }
  0xad   : > { %3034 = vmatprep.subr.msk.mxu0 %vm680_vm2, %v1248_v5 }
  0xae   : > { %v1345_v7 = vpop.permute.xlu1 %1344  ;;  %3035 = vmatpush1.msk.msra.mxu0 %vm680_vm2, %v1247_v4  ;;  %v1343_v8 = vpop.permute.xlu0 %1342 }
  0xaf   : > { %v1348_v9 = vsel %vm1346_vm12, %v1343_v8, %v1345_v7  ;;  %3036 = vmatmul.mubr.msk.f32.vlgmr.msra.gmra.mxu0 %vm676_vm5, %v3033_v6 }
  0xb0   : > { %3038 = vmatprep.subr.msk.mxu1 %vm680_vm2, %v1348_v9  ;;  %1522 = vmatprep.mubr.f32.mxu0 %v3171_v0 }
  0xb2   : > { %v1437_v10 = vpop.permute.xlu1 %1436  ;;  %v1341_v11 = vpop.permute.xlu0 %1340 }
  0xb3   : > { %v1347_v13 = vsel %vm1346_vm12, %v1341_v11, %v1343_v8 }
  0xb4   : > { %3039 = vmatpush1.msk.msra.mxu1 %vm680_vm2, %v1347_v13 }
  0xb5   : > { %3040 = vmatmul.mubr.msk.f32.vlgmr.msra.gmra.mxu1 %vm676_vm5, %v3037_v12  ;;  %v1565_v12 = vld [vmem:[%s3734_s3] sm:$0xff] }
  0xb6   : > { %v1435_v14 = vpop.permute.xlu1 %1434  ;;  %v1439_v15 = vpop.permute.xlu0 %1438  ;;  %1651 = vmatprep.mubr.f32.mxu1 %v3171_v0 }
  0xb7   : > { %v1441_v16 = vsel %vm1440_vm13, %v1435_v14, %v1437_v10  ;;  %v1442_v17 = vsel %vm1440_vm13, %v1437_v10, %v1439_v15 }
  0xb8   : > { %v1445_v18 = vsel %vm3357_vm7, %v1441_v16, 0.0  ;;  %v1446_v19 = vsel %vm3361_vm8, %v1442_v17, 0.0  ;;  %v3045_v16 = vld [vmem:[%s3734_s3 + $0x10] sm:$0xff]  ;;  %v1566_v17 = vld [vmem:[%s3734_s3 + $0x8] sm:$0xff] }
  0xb9   : > { %3042 = vmatprep.subr.msk.mxu0 %vm680_vm2, %v1446_v19 }
  0xba   : > { %3043 = vmatpush1.msk.msra.mxu0 %vm680_vm2, %v1445_v18  ;;  %v1554_v4 = vpop.permute.xlu1 %1553 }
  0xbb   : > { %3044 = vmatmul.mubr.msk.f32.vlgmr.msra.gmra.mxu0 %vm676_vm5, %v3041_v20 }
  0xbc   : > { %1734 = vmatprep.mubr.f32.mxu0 %v3171_v0 }
  0xc3   : > { %v1535_v55 = vpop.permute.xlu0 %1534 }
  0xc7   : > { %v1571_v3 = vpop.permute.xlu0 %1570 }
  0xcb   : > { %v1748_v5 = vpop.permute.xlu0 %1747 }
 0x15a   : > { %v751_v21 = vpop.f32.mrf.mxu0 }
 0x15b   : > { %v831_v23 = vpop.f32.mrf.mxu1 }
 0x15c   : > { %v753_v22 = vpop.f32.mrf.mxu0  ;;  %v832_v28 = vadd.f32 %v831_v23, %v751_v21 }
 0x15d   : > { %v833_v24 = vpop.f32.mrf.mxu1 }
 0x15e   : > { %v834_v29 = vadd.f32 %v833_v24, %v753_v22  ;;  %v3046_v22 = vld [vmem:[%s3734_s3 + $0x18] sm:$0xff] }
 0x15f   : > { %v935_v27 = vpop.f32.mrf.mxu0 }
 0x160   : > { %v940_v32 = vadd.f32 %v935_v27, %v832_v28  ;;  %v3053_v28 = vld [vmem:[%s3734_s3 + $0x20] sm:$0xff] }
 0x161   : > { %v937_v30 = vpop.f32.mrf.mxu0 }
 0x162   : > { %v941_v33 = vadd.f32 %v937_v30, %v834_v29 }
 0x163   : > { %v1037_v31 = vpop.f32.mrf.mxu1  ;;  %v1122_v35 = vpop.f32.mrf.mxu0 }
 0x164   : > { %v1042_v36 = vadd.f32 %v1037_v31, %v940_v32  ;;  %v3059_v31 = vld [vmem:[%s3734_s3 + $0x30] sm:$0xff] }
 0x165   : > { %v1039_v34 = vpop.f32.mrf.mxu1  ;;  %v1124_v40 = vpop.f32.mrf.mxu0 }
 0x166   : > { %v1043_v39 = vadd.f32 %v1039_v34, %v941_v33  ;;  %v1127_v42 = vadd.f32 %v1122_v35, %v1042_v36  ;;  %v3054_v33 = vld [vmem:[%s3734_s3 + $0x28] sm:$0xff]  ;;  %v3060_v36 = vld [vmem:[%s3734_s3 + $0x38] sm:$0xff] }
 0x168   : > { %v1128_v43 = vadd.f32 %v1124_v40, %v1043_v39  ;;  %v3065_v40 = vld [vmem:[%s3734_s3 + $0x40] sm:$0xff] }
 0x16a   : > { %v1224_v41 = vpop.f32.mrf.mxu1 }
 0x16b   : > { %v1229_v46 = vadd.f32 %v1224_v41, %v1127_v42 }
 0x16c   : > { %v1226_v44 = vpop.f32.mrf.mxu1 }
 0x16d   : > { %v1230_v47 = vadd.f32 %v1226_v44, %v1128_v43  ;;  %v3069_v44 = vld [vmem:[%s3734_s3 + $0x50] sm:$0xff] }
 0x16f   : > { %v1326_v45 = vpop.f32.mrf.mxu0 }
 0x170   : > { %v1331_v50 = vadd.f32 %v1326_v45, %v1229_v46  ;;  %v3066_v45 = vld [vmem:[%s3734_s3 + $0x48] sm:$0xff] }
 0x171   : > { %v1328_v48 = vpop.f32.mrf.mxu0 }
 0x172   : > { %v1332_v51 = vadd.f32 %v1328_v48, %v1230_v47  ;;  %v3070_v47 = vld [vmem:[%s3734_s3 + $0x58] sm:$0xff] }
 0x175   : > { %v1422_v49 = vpop.f32.mrf.mxu1 }
 0x176   : > { %v1427_v53 = vadd.f32 %v1422_v49, %v1331_v50  ;;  %v3075_v50 = vld [vmem:[%s3734_s3 + $0x60] sm:$0xff] }
 0x177   : > { %v1424_v52 = vpop.f32.mrf.mxu1 }
 0x178   : > { %v1428_v56 = vadd.f32 %v1424_v52, %v1332_v51 }
 0x17b   : > { %v1524_v54 = vpop.f32.mrf.mxu0 }
 0x17c   : > { %v1529_v57 = vadd.f32 %v1524_v54, %v1427_v53  ;;  %v3076_v54 = vld [vmem:[%s3734_s3 + $0x68] sm:$0xff] }
 0x17d   : > { %v1526_v58 = vpop.f32.mrf.mxu0 }
 0x17e   : > { %v1530_v59 = vadd.f32 %v1526_v58, %v1428_v56  ;;  %v1537_v60 = vadd.f32 %v1535_v55, %v1529_v57  ;;  %v3082_v58 = vld [vmem:[%s3734_s3 + $0x78] sm:$0xff] }
 0x180   : > { %v1538_v61 = vadd.f32 %v1535_v55, %v1530_v59  ;;  %v3464_v62 = vmax.f32 %v1537_v60, 0.0  ;;  %2590 = vst [vmem:[%s571_s26] sm:$0xff] %v1537_v60  ;;  %v3085_v60 = vld [vmem:[%s3734_s3 + $0x80] sm:$0xff] }
 0x182   : > { %v3466_v63 = vmax.f32 %v1538_v61, 0.0  ;;  %2591 = vst [vmem:[%s571_s26 + $0x8] sm:$0xff] %v1538_v61  ;;  %2592 = vst [vmem:[%s576_s19] sm:$0xff] %v3464_v62  ;;  %1749 = vrot.lane.b32.xlu0 %v3464_v62, %s3174_s30  ;;  %1572 = vrot.lane.b32.xlu1 %v3464_v62, %s3173_s29 }
 0x184   : > { %2593 = vst [vmem:[%s576_s19 + $0x8] sm:$0xff] %v3466_v63 }
 0x186   : > { %1557 = vrot.lane.b32.xlu0 %v3466_v63, %s3172_s28  ;;  %1555 = vrot.lane.b32.xlu1 %v3464_v62, %s3172_s28  ;;  %s3762_s28 = smov 112  }
 0x18a   : > { %2047 = vrot.lane.b32.xlu0 %v3464_v62, %s3176_s17  ;;  %1574 = vrot.lane.b32.xlu1 %v3466_v63, %s3173_s29  ;;  %s3763_s29 = smov 111  }
 0x18e   : > { %1853 = vrot.lane.b32.xlu0 %v3466_v63, %s3175_s0  ;;  %1851 = vrot.lane.b32.xlu1 %v3464_v62, %s3175_s0 }
 0x192   : > { %2153 = vrot.lane.b32.xlu0 %v3171_v0, %s3177_s18  ;;  %1751 = vrot.lane.b32.xlu1 %v3466_v63, %s3174_s30 }
 0x196   : > { %2049 = vrot.lane.b32.xlu0 %v3466_v63, %s3176_s17  ;;  %1849 = vrot.lane.b32.xlu1 %v3171_v0, %s3175_s0 }
 0x19a   : > { %2254 = vrot.lane.b32.xlu0 %v3464_v62, %s3762_s28  ;;  %2051 = vrot.lane.b32.xlu1 %v3171_v0, %s3176_s17  ;;  %s591_s17 = scalar_lea.vmem %s3744_s13, %s3454_s23 }
 0x19e   : > { %2256 = vrot.lane.b32.xlu0 %v3466_v63, %s3762_s28  ;;  %2149 = vrot.lane.b32.xlu1 %v3464_v62, %s3177_s18 }
 0x1a2   : > { %2355 = vrot.lane.b32.xlu0 %v3171_v0, %s3763_s29  ;;  %2151 = vrot.lane.b32.xlu1 %v3466_v63, %s3177_s18  ;;  %s3649_s18 = sshll.u32 %s3765_s22, 5 }
 0x1a3   : > { %s581_s25 = scalar_lea.vmem %s3742_s11, %s3649_s18  ;;  %s586_s27 = scalar_lea.vmem %s3743_s12, %s3649_s18 }
 0x1a4   : > { %s596_s19 = scalar_lea.vmem %s3745_s14, %s3649_s18  ;;  %s601_s26 = scalar_lea.vmem %s3746_s15, %s3649_s18 }
 0x1a6   : > { %2462 = vperm.xlu0 %3159, %v2454_v1   ;;  %2258 = vrot.lane.b32.xlu1 %v3171_v0, %s3762_s28 }
 0x1aa   : > { %2353 = vrot.lane.b32.xlu1 %v3466_v63, %s3763_s29 }
 0x1ae   : > { %2351 = vrot.lane.b32.xlu1 %v3464_v62, %s3763_s29 }
 0x1b2   : > { %2457 = vperm.xlu1 %3160, %v2453_v2  }
 0x1f4   : > { %v1573_v6 = vpop.permute.xlu1 %1572  ;;  %v1750_v7 = vpop.permute.xlu0 %1749 }
 0x1f5   : > { %v1576_v18 = vsel %vm673_vm1, %v1571_v3, %v1573_v6  ;;  %v1753_v29 = vsel %vm851_vm6, %v1748_v5, %v1750_v7 }
 0x1f8   : > { %v1556_v8 = vpop.permute.xlu1 %1555  ;;  %v1558_v9 = vpop.permute.xlu0 %1557 }
 0x1f9   : > { %v1559_v10 = vsel %vm657_vm0, %v1554_v4, %v1556_v8  ;;  %v1560_v11 = vsel %vm657_vm0, %v1556_v8, %v1558_v9  ;;  %vm2699_vm0 = vcmask 1024  }
 0x1fa   : > { %3049 = vmatprep.subr.msk.mxu0 %vm3332_vm3, %v1560_v11 }
 0x1fb   : > { %3050 = vmatpush1.msk.msra.mxu0 %vm3336_vm4, %v1559_v10 }
 0x1fc   : > { %v1575_v13 = vpop.permute.xlu1 %1574  ;;  %v2048_v14 = vpop.permute.xlu0 %2047  ;;  %3051 = vmatmul.mubr.msk.f32.vlgmr.msra.gmra.mxu0 %vm1580_vm14, %v1565_v12 }
 0x1fd   : > { %v1577_v15 = vsel %vm673_vm1, %v1573_v6, %v1575_v13  ;;  %1740 = vmatprep.mubr.f32.mxu0 %v3171_v0 }
 0x1fe   : > { %1617 = vmatprep.subr.mxu1 %v1577_v15 }
 0x1ff   : > { %1618 = vmatpush1.msra.mxu1 %v1576_v18 }
 0x200   : > { %v1852_v19 = vpop.permute.xlu1 %1851  ;;  %3047 = vmatmul.mubr.msk.f32.vlgmr.msra.gmra.mxu1 %vm1580_vm14, %v3045_v16  ;;  %v1854_v20 = vpop.permute.xlu0 %1853  ;;  %3052 = vmatmul.mubr.msk.f32.gmra.mxu0 %vm1580_vm14, %v1566_v17 }
 0x201   : > { %v1856_v21 = vsel %vm953_vm9, %v1852_v19, %v1854_v20  ;;  %1657 = vmatprep.mubr.f32.mxu1 %v3171_v0  ;;  %1934 = vmatprep.mubr.f32.mxu0 %v3171_v0 }
 0x202   : > { %3061 = vmatprep.subr.msk.mxu0 %vm3332_vm3, %v1856_v21 }
 0x204   : > { %v1752_v23 = vpop.permute.xlu1 %1751  ;;  %3048 = vmatmul.mubr.msk.f32.gmra.mxu1 %vm1580_vm14, %v3046_v22  ;;  %v2154_v24 = vpop.permute.xlu0 %2153 }
 0x205   : > { %v1754_v27 = vsel %vm851_vm6, %v1750_v7, %v1752_v23  ;;  %1832 = vmatprep.mubr.f32.mxu1 %v3171_v0 }
 0x206   : > { %3055 = vmatprep.subr.msk.mxu1 %vm3361_vm8, %v1754_v27 }
 0x207   : > { %3056 = vmatpush1.msk.msra.mxu1 %vm3357_vm7, %v1753_v29 }
 0x208   : > { %v1850_v30 = vpop.permute.xlu1 %1849  ;;  %3057 = vmatmul.mubr.msk.f32.vlgmr.msra.gmra.mxu1 %vm1580_vm14, %v3053_v28  ;;  %1990 = vmatprep.subr.mxu1 %v3466_v63  ;;  %v2050_v34 = vpop.permute.xlu0 %2049 }
 0x209   : > { %v1855_v32 = vsel %vm953_vm9, %v1850_v30, %v1852_v19  ;;  %1991 = vmatpush1.msra.mxu1 %v3464_v62  ;;  %1838 = vmatprep.mubr.f32.mxu1 %v3171_v0  ;;  %v2053_v41 = vsel %vm1140_vm10, %v2048_v14, %v2050_v34 }
 0x20a   : > { %3062 = vmatpush1.msk.msra.mxu0 %vm3336_vm4, %v1855_v32 }
 0x20b   : > { %3063 = vmatmul.mubr.msk.f32.vlgmr.msra.gmra.mxu0 %vm1580_vm14, %v3059_v31 }
 0x20c   : > { %v2052_v35 = vpop.permute.xlu1 %2051  ;;  %3058 = vmatmul.mubr.msk.f32.gmra.mxu1 %vm1580_vm14, %v3054_v33  ;;  %1940 = vmatprep.mubr.f32.mxu0 %v3171_v0  ;;  %v2255_v42 = vpop.permute.xlu0 %2254 }
 0x20d   : > { %v2054_v39 = vsel %vm1140_vm10, %v2050_v34, %v2052_v35  ;;  %2024 = vmatprep.mubr.f32.mxu1 %v3171_v0 }
 0x20e   : > { %3071 = vmatprep.subr.msk.mxu0 %vm3361_vm8, %v2054_v39 }
 0x20f   : > { %3064 = vmatmul.mubr.msk.f32.gmra.mxu0 %vm1580_vm14, %v3060_v36 }
 0x210   : > { %3072 = vmatpush1.msk.msra.mxu0 %vm3357_vm7, %v2053_v41  ;;  %v2150_v43 = vpop.permute.xlu1 %2149  ;;  %3067 = vmatmul.mubr.msk.f32.vlgmr.msra.gmra.mxu1 %vm1580_vm14, %v3065_v40  ;;  %v2257_v51 = vpop.permute.xlu0 %2256 }
 0x211   : > { %2132 = vmatprep.mubr.f32.mxu0 %v3171_v0  ;;  %2030 = vmatprep.mubr.f32.mxu1 %v3171_v0  ;;  %v2260_v26 = vsel %vm1346_vm12, %v2255_v42, %v2257_v51 }
 0x213   : > { %3073 = vmatmul.mubr.msk.f32.vlgmr.msra.gmra.mxu0 %vm1580_vm14, %v3069_v44 }
 0x214   : > { %v2152_v46 = vpop.permute.xlu1 %2151  ;;  %3068 = vmatmul.mubr.msk.f32.gmra.mxu1 %vm1580_vm14, %v3066_v45  ;;  %2138 = vmatprep.mubr.f32.mxu0 %v3171_v0  ;;  %v2356_v55 = vpop.permute.xlu0 %2355 }
 0x215   : > { %v2155_v48 = vsel %vm1242_vm11, %v2150_v43, %v2152_v46  ;;  %v2156_v49 = vsel %vm1242_vm11, %v2152_v46, %v2154_v24  ;;  %2234 = vmatprep.mubr.f32.mxu1 %v3171_v0 }
 0x216   : > { %3077 = vmatprep.subr.msk.mxu1 %vm3332_vm3, %v2156_v49 }
 0x217   : > { %3074 = vmatmul.mubr.msk.f32.gmra.mxu0 %vm1580_vm14, %v3070_v47  ;;  %3078 = vmatpush1.msk.msra.mxu1 %vm3336_vm4, %v2155_v48 }
 0x218   : > { %v2259_v52 = vpop.permute.xlu1 %2258  ;;  %3079 = vmatmul.mubr.msk.f32.vlgmr.msra.gmra.mxu1 %vm1580_vm14, %v3075_v50  ;;  %2334 = vmatprep.mubr.f32.mxu0 %v3171_v0 }
 0x219   : > { %v2261_v53 = vsel %vm1346_vm12, %v2257_v51, %v2259_v52  ;;  %2240 = vmatprep.mubr.f32.mxu1 %v3171_v0 }
 0x21a   : > { %2300 = vmatprep.subr.mxu0 %v2261_v53 }
 0x21b   : > { %2301 = vmatpush1.msra.mxu0 %v2260_v26 }
 0x21c   : > { %v2354_v56 = vpop.permute.xlu1 %2353  ;;  %3080 = vmatmul.mubr.msk.f32.gmra.mxu1 %vm1580_vm14, %v3076_v54  ;;  %3083 = vmatmul.mubr.msk.f32.vlgmr.msra.gmra.mxu0 %vm1580_vm14, %v3081_v25 }
 0x21d   : > { %v2358_v57 = vsel %vm1440_vm13, %v2354_v56, %v2356_v55  ;;  %2340 = vmatprep.mubr.f32.mxu0 %v3171_v0  ;;  %2436 = vmatprep.mubr.f32.mxu1 %v3171_v0 }
 0x21e   : > { %3087 = vmatprep.subr.msk.mxu1 %vm3361_vm8, %v2358_v57 }
 0x220   : > { %v2352_v59 = vpop.permute.xlu1 %2351  ;;  %3084 = vmatmul.mubr.msk.f32.gmra.mxu0 %vm1580_vm14, %v3082_v58 }
 0x221   : > { %v2357_v61 = vsel %vm1440_vm13, %v2352_v59, %v2354_v56 }
 0x222   : > { %3088 = vmatpush1.msk.msra.mxu1 %vm3357_vm7, %v2357_v61 }
 0x223   : > { %3089 = vmatmul.mubr.msk.f32.vlgmr.msra.gmra.mxu1 %vm1580_vm14, %v3085_v60 }
 0x224   : > { %2442 = vmatprep.mubr.f32.mxu1 %v3171_v0 }
 0x227   : > { %3090 = vmatmul.mubr.msk.f32.gmra.mxu1 %vm1580_vm14, %v3086_v38 }
 0x22d   : > { %v2458_v25 = vpop.permute.xlu1 %2457 }
 0x2bc   : > { %v1736_v62 = vpop.f32.mrf.mxu0 }
 0x2be   : > { %v1738_v1 = vpop.f32.mrf.mxu0 }
 0x2c0   : > { %v1653_v63 = vpop.f32.mrf.mxu1  ;;  %v1742_v4 = vpop.f32.mrf.mxu0 }
 0x2c1   : > { %v1737_v14 = vadd.f32 %v1736_v62, %v1653_v63 }
 0x2c2   : > { %v1655_v2 = vpop.f32.mrf.mxu1  ;;  %v1744_v37 = vpop.f32.mrf.mxu0 }
 0x2c3   : > { %v1739_v17 = vadd.f32 %v1738_v1, %v1655_v2 }
 0x2c4   : > { %v1659_v3 = vpop.f32.mrf.mxu1 }
 0x2c5   : > { %v1743_v21 = vadd.f32 %v1742_v4, %v1659_v3 }
 0x2c6   : > { %v1661_v5 = vpop.f32.mrf.mxu1 }
 0x2c7   : > { %v1745_v27 = vadd.f32 %v1744_v37, %v1661_v5  ;;  %v2463_v5 = vpop.permute.xlu0 %2462 }
 0x2c8   : > { %v1834_v6 = vpop.f32.mrf.mxu1 }
 0x2c9   : > { %v1845_v18 = vadd.f32 %v1834_v6, %v1737_v14 }
 0x2ca   : > { %v1836_v7 = vpop.f32.mrf.mxu1 }
 0x2cb   : > { %v1936_v8 = vpop.f32.mrf.mxu0  ;;  %v1846_v22 = vadd.f32 %v1836_v7, %v1739_v17 }
 0x2cc   : > { %v1840_v9 = vpop.f32.mrf.mxu1  ;;  %v1947_v28 = vadd.f32 %v1936_v8, %v1845_v18  ;;  %v2482_v18 = vld [vmem:[%s3736_s5 + $0x8] sm:$0xff] }
 0x2cd   : > { %v1938_v10 = vpop.f32.mrf.mxu0  ;;  %v1847_v29 = vadd.f32 %v1840_v9, %v1743_v21  ;;  %v2612_v21 = vld [vmem:[%s3738_s7] sm:$0xff] }
 0x2ce   : > { %v1842_v0 = vpop.f32.mrf.mxu1  ;;  %v1948_v32 = vadd.f32 %v1938_v10, %v1846_v22  ;;  %3138 = vmatprep.mubr.msk.f32.mxu1 %vm2616_vm15, %v2612_v21  ;;  %v2486_v22 = vld [vmem:[%s3737_s6 + $0x8] sm:$0xff] }
 0x2cf   : > { %v1942_v11 = vpop.f32.mrf.mxu0  ;;  %v1848_v33 = vadd.f32 %v1842_v0, %v1745_v27 }
 0x2d0   : > { %v2026_v12 = vpop.f32.mrf.mxu1  ;;  %v1949_v36 = vadd.f32 %v1942_v11, %v1847_v29  ;;  %v2488_v29 = vld [vmem:[%s3737_s6 + $0x18] sm:$0xff] }
 0x2d1   : > { %v1944_v13 = vpop.f32.mrf.mxu0  ;;  %v2037_v34 = vadd.f32 %v2026_v12, %v1947_v28 }
 0x2d2   : > { %v2028_v15 = vpop.f32.mrf.mxu1  ;;  %v1950_v42 = vadd.f32 %v1944_v13, %v1848_v33  ;;  %v2481_v13 = vld [vmem:[%s3736_s5] sm:$0xff]  ;;  %v2487_v33 = vld [vmem:[%s3737_s6 + $0x10] sm:$0xff] }
 0x2d3   : > { %v2134_v16 = vpop.f32.mrf.mxu0  ;;  %v2038_v39 = vadd.f32 %v2028_v15, %v1948_v32  ;;  %3124 = vmatprep.mubr.msk.f32.mxu0 %vm673_vm1, %v2481_v13 }
 0x2d4   : > { %v2032_v19 = vpop.f32.mrf.mxu1  ;;  %v2145_v43 = vadd.f32 %v2134_v16, %v2037_v34 }
 0x2d5   : > { %v2136_v20 = vpop.f32.mrf.mxu0  ;;  %v2039_v44 = vadd.f32 %v2032_v19, %v1949_v36  ;;  %v2483_v19 = vld [vmem:[%s3736_s5 + $0x10] sm:$0xff] }
 0x2d6   : > { %v2034_v23 = vpop.f32.mrf.mxu1  ;;  %v2146_v46 = vadd.f32 %v2136_v20, %v2038_v39  ;;  %v2484_v20 = vld [vmem:[%s3736_s5 + $0x18] sm:$0xff] }
 0x2d7   : > { %v2140_v24 = vpop.f32.mrf.mxu0  ;;  %v2040_v47 = vadd.f32 %v2034_v23, %v1950_v42  ;;  %v2613_v42 = vld [vmem:[%s3738_s7 + $0x8] sm:$0x3] }
 0x2d8   : > { %v2236_v30 = vpop.f32.mrf.mxu1  ;;  %v2147_v51 = vadd.f32 %v2140_v24, %v2039_v44  ;;  %v2485_v24 = vld [vmem:[%s3737_s6] sm:$0xff] }
 0x2d9   : > { %v2142_v31 = vpop.f32.mrf.mxu0  ;;  %v2247_v48 = vadd.f32 %v2236_v30, %v2145_v43  ;;  %v2615_v43 = vld [vmem:[%s3739_s8 + $0x8] sm:$0x3] }
 0x2da   : > { %v2238_v35 = vpop.f32.mrf.mxu1  ;;  %v2148_v26 = vadd.f32 %v2142_v31, %v2040_v47 }
 0x2db   : > { %v2248_v52 = vadd.f32 %v2238_v35, %v2146_v46 }
 0x2dc   : > { %v2336_v40 = vpop.f32.mrf.mxu0  ;;  %v2242_v41 = vpop.f32.mrf.mxu1 }
 0x2dd   : > { %v2347_v53 = vadd.f32 %v2336_v40, %v2247_v48  ;;  %v2249_v55 = vadd.f32 %v2242_v41, %v2147_v51 }
 0x2de   : > { %v2338_v45 = vpop.f32.mrf.mxu0  ;;  %v2244_v49 = vpop.f32.mrf.mxu1 }
 0x2df   : > { %v2348_v56 = vadd.f32 %v2338_v45, %v2248_v52  ;;  %v2250_v60 = vadd.f32 %v2244_v49, %v2148_v26  ;;  %v2614_v45 = vld [vmem:[%s3739_s8] sm:$0xff] }
 0x2e0   : > { %v2342_v50 = vpop.f32.mrf.mxu0 }
 0x2e1   : > { %v2349_v61 = vadd.f32 %v2342_v50, %v2249_v55 }
 0x2e2   : > { %v2344_v58 = vpop.f32.mrf.mxu0 }
 0x2e3   : > { %v2438_v54 = vpop.f32.mrf.mxu1  ;;  %v2350_v1 = vadd.f32 %v2344_v58, %v2250_v60 }
 0x2e4   : > { %v2449_v57 = vadd.f32 %v2438_v54, %v2347_v53 }
 0x2e5   : > { %v2440_v59 = vpop.f32.mrf.mxu1 }
 0x2e6   : > { %v2465_v38 = vadd.f32 %v2458_v25, %v2449_v57  ;;  %v2450_v62 = vadd.f32 %v2440_v59, %v2348_v56 }
 0x2e7   : > { %v2444_v63 = vpop.f32.mrf.mxu1 }
 0x2e8   : > { %2594 = vst [vmem:[%s581_s25] sm:$0xff] %v2465_v38  ;;  %v2466_v2 = vadd.f32 %v2458_v25, %v2450_v62  ;;  %v2451_v3 = vadd.f32 %v2444_v63, %v2349_v61  ;;  %v2469_v4 = vmax.f32 %v2465_v38, 0.0 }
 0x2e9   : > { %v2446_v6 = vpop.f32.mrf.mxu1 }
 0x2ea   : > { %2595 = vst [vmem:[%s581_s25 + $0x8] sm:$0xff] %v2466_v2  ;;  %v2467_v37 = vadd.f32 %v2463_v5, %v2451_v3  ;;  %v2452_v7 = vadd.f32 %v2446_v6, %v2350_v1  ;;  %v2470_v8 = vmax.f32 %v2466_v2, 0.0  ;;  %2598 = vst [vmem:[%s586_s27] sm:$0xff] %v2469_v4 }
 0x2ec   : > { %2596 = vst [vmem:[%s581_s25 + $0x10] sm:$0xff] %v2467_v37  ;;  %v2468_v9 = vadd.f32 %v2463_v5, %v2452_v7  ;;  %v2473_v10 = vadd.f32 %v2470_v8, %v2469_v4  ;;  %2599 = vst [vmem:[%s586_s27 + $0x8] sm:$0xff] %v2470_v8  ;;  %v2471_v0 = vmax.f32 %v2467_v37, 0.0 }
 0x2ee   : > { %2597 = vst [vmem:[%s581_s25 + $0x18] sm:$0xff] %v2468_v9  ;;  %2474 = vadd.xlane.f32.xlu1 %v2473_v10  ;;  %v2472_v11 = vmax.f32 %v2468_v9, 0.0  ;;  %2600 = vst [vmem:[%s586_s27 + $0x10] sm:$0xff] %v2471_v0  ;;  %s606_s25 = scalar_lea.vmem %s3747_s16, %s3454_s23 }
 0x2f0   : > { %v2476_v12 = vadd.f32 %v2472_v11, %v2471_v0  ;;  %2601 = vst [vmem:[%s586_s27 + $0x18] sm:$0xff] %v2472_v11 }
 0x2f2   : > { %2477 = vadd.xlane.f32.xlu0 %v2476_v12 }
 0x377   : > { %v2475_v14 = vpop.xlane.xlu1 %2474 }
 0x378   : > { %v2479_v15 = vmul.f32 0.00390625, %v2475_v14 }
 0x37a   : > { %2602 = vst.msk [vmem:[%s591_s17] sm:$0xff] %vm953_vm9, %v2479_v15 }
 0x37b   : > { %v2478_v16 = vpop.xlane.xlu0 %2477 }
 0x37c   : > { %v2480_v17 = vmul.f32 0.00390625, %v2478_v16 }
 0x37e   : > { %2603 = vst.msk [vmem:[%s591_s17 + $0x8] sm:$0xff] %vm953_vm9, %v2480_v17  ;;  %3120 = vmatprep.subr.mxu0 %v2480_v17 }
 0x37f   : > { %3121 = vmatpush3.msra.mxu0 %v2480_v17 }
 0x380   : > { %3122 = vmatprep.subr.mxu0 %v2479_v15 }
 0x381   : > { %3123 = vmatpush3.msra.mxu0 %v2479_v15 }
 0x382   : > { %3125 = vmatmul.mubr.msk.f32.vlgmr.msra.gmra.mxu0 %vm673_vm1, %v2482_v18 }
 0x383   : > { %3127 = vmatprep.mubr.msk.f32.mxu0 %vm673_vm1, %v2483_v19 }
 0x386   : > { %3128 = vmatmul.mubr.msk.f32.gmra.mxu0 %vm673_vm1, %v2484_v20 }
 0x442   : > { %v3126_v23 = vpop.f32.mrf.mxu0 }
 0x443   : > { %v2573_v27 = vadd.f32 %v3126_v23, %v2486_v22 }
 0x444   : > { %v2567_v28 = vpop.f32.mrf.mxu0 }
 0x445   : > { %v2587_v30 = vmax.f32 %v2573_v27, 0.0  ;;  %2605 = vst.msk [vmem:[%s596_s19 + $0x8] sm:$0xff] %vm953_vm9, %v2573_v27  ;;  %v2568_v31 = vadd.f32 %v2567_v28, %v2485_v24 }
 0x446   : > { %v3129_v32 = vpop.f32.mrf.mxu0 }
 0x447   : > { %2609 = vst.msk [vmem:[%s601_s26 + $0x8] sm:$0xff] %vm953_vm9, %v2587_v30  ;;  %v2586_v34 = vmax.f32 %v2568_v31, 0.0  ;;  %2604 = vst.msk [vmem:[%s596_s19] sm:$0xff] %vm953_vm9, %v2568_v31  ;;  %v2583_v35 = vadd.f32 %v3129_v32, %v2488_v29 }
 0x448   : > { %v2577_v36 = vpop.f32.mrf.mxu0 }
 0x449   : > { %2608 = vst.msk [vmem:[%s601_s26] sm:$0xff] %vm953_vm9, %v2586_v34  ;;  %v2589_v39 = vmax.f32 %v2583_v35, 0.0  ;;  %2607 = vst.msk [vmem:[%s596_s19 + $0x18] sm:$0xff] %vm953_vm9, %v2583_v35  ;;  %v2578_v40 = vadd.f32 %v2577_v36, %v2487_v33 }
 0x44b   : > { %2611 = vst.msk [vmem:[%s601_s26 + $0x18] sm:$0xff] %vm953_vm9, %v2589_v39  ;;  %v2588_v41 = vmax.f32 %v2578_v40, 0.0  ;;  %2606 = vst.msk [vmem:[%s596_s19 + $0x10] sm:$0xff] %vm953_vm9, %v2578_v40  ;;  %3130 = vmatprep.subr.mxu1 %v2589_v39 }
 0x44c   : > { %3131 = vmatpush3.msra.mxu1 %v2589_v39 }
 0x44d   : > { %2610 = vst.msk [vmem:[%s601_s26 + $0x10] sm:$0xff] %vm953_vm9, %v2588_v41  ;;  %3132 = vmatprep.subr.mxu1 %v2588_v41 }
 0x44e   : > { %3133 = vmatpush3.msra.mxu1 %v2588_v41 }
 0x44f   : > { %3134 = vmatprep.subr.mxu1 %v2587_v30 }
 0x450   : > { %3135 = vmatpush3.msra.mxu1 %v2587_v30 }
 0x451   : > { %3136 = vmatprep.subr.mxu1 %v2586_v34 }
 0x452   : > { %3137 = vmatpush3.msra.mxu1 %v2586_v34 }
 0x453   : > { %3139 = vmatmul.mubr.msk.f32.vlgmr.msra.gmra.mxu1 %vm2616_vm15, %v2613_v42 }
 0x513   : > { %v3140_v44 = vpop.f32.mrf.mxu1 }
 0x514   : > { %v2695_v46 = vadd.f32 %v3140_v44, %v2615_v43 }
 0x515   : > { %v2689_v47 = vpop.f32.mrf.mxu1 }
 0x516   : > { %2700 = vst.msk [vmem:[%s606_s25 + $0x8] sm:$0x3] %vm2699_vm0, %v2695_v46  ;;  %v2690_v48 = vadd.f32 %v2689_v47, %v2614_v45 }
 0x518   : > { %2698 = vst.msk [vmem:[%s606_s25] sm:$0xff] %vm953_vm9, %v2690_v48 }
 0x519 PF: > { %s27_s21 = sadd.s32 1, %s3169_s21  }
 0x51a   : > { %p24_p4 = scmp.ge.s32.totalorder %s27_s21, 4  }
 0x51c   :  { %26 = sbr.rel (!%p24_p4) target bundleno = 2 (0x2), region = 186 }

</bundles_post_ra>
